<compile_context>
chip_gen: v7x
topology: tpu7x:2x2x1
jax: 0.10.0
libtpu: 0.0.40
codegen_flags: <defaults>
</compile_context>

<pallas_src>
import jax
import jax.numpy as jnp
from jax.experimental import pallas as pl
from jax.experimental.pallas import tpu as pltpu


def _round_up(n, m):
    return -(-n // m) * m


def residual_ffn_ln_kernel(x_ref, w1_ref, b1_ref, w2_ref, p_ref, o_ref):
    """One (TILE, DIM) row-tile of tokens.

    x_ref : (TILE, DIM)   input rows (input dtype)
    w1_ref: (DIM, HID)    bf16
    b1_ref: (1, HID)      f32
    w2_ref: (HID, DIM)    bf16
    p_ref : (3, DIM)      f32 rows = [b2; gamma; beta]
    """
    x = x_ref[...].astype(jnp.float32)

    # sublayer(x) = ReLU(x @ W1 + b1) @ W2 + b2
    # bf16 operands on the MXU, f32 accumulation.
    h = jnp.dot(x.astype(jnp.bfloat16), w1_ref[...],
                preferred_element_type=jnp.float32) + b1_ref[...]
    h = jnp.maximum(h, 0.0)
    s = jnp.dot(h.astype(jnp.bfloat16), w2_ref[...],
                preferred_element_type=jnp.float32)

    p = p_ref[...]                       # (3, DIM): b2, gamma, beta
    s = s + p[0:1, :]

    # residual add + LayerNorm (all f32 on the VPU / XLU / EUP)
    r = x + s
    mean = jnp.mean(r, axis=-1, keepdims=True)
    cen = r - mean
    var = jnp.mean(cen * cen, axis=-1, keepdims=True)
    inv = jax.lax.rsqrt(var + 1e-5)
    y = cen * inv * p[1:2, :] + p[2:3, :]

    o_ref[...] = y.astype(o_ref.dtype)


def _const_spec(shape, mode):
    """BlockSpec with constant index_map; optional pipeline_mode."""
    if mode is None:
        return pl.BlockSpec(shape, lambda i: (0, 0))
    return pl.BlockSpec(shape, lambda i: (0, 0), pipeline_mode=mode)


def residual_forward(x, w1, b1, w2, b2, gamma, beta, *, tile_rows=512):
    """LayerNorm(x + FFN(x)); x: (m, len, dim).

    tile_rows: row-tile size (big tiles amortize the ~0.35 us per-grid-step
    overhead); clamped so the grid is >= 2 when the row count allows it
    (megacore sharding on v7x).
    """
    m, seq, dim = x.shape
    hidden = w1.shape[1]
    rows = m * seq

    # --- tiling: large row tiles; keep grid >= 2 when possible (v7x: 2 TCs) ---
    tile = min(tile_rows, max(8, _round_up(-(-rows // 2), 8)))
    padded_rows = _round_up(rows, tile)
    grid = (padded_rows // tile,)

    x2d = x.reshape(rows, dim)
    if padded_rows != rows:
        x2d = jnp.pad(x2d, ((0, padded_rows - rows), (0, 0)))

    # bf16 weights for the MXU; f32 bias / LN params packed lane-dense.
    w1b = w1.astype(jnp.bfloat16)
    w2b = w2.astype(jnp.bfloat16)
    b1_2d = b1.reshape(1, hidden).astype(jnp.float32)
    packed = jnp.stack([b2, gamma, beta]).astype(jnp.float32)   # (3, dim)

    # --- explicit VMEM budget (conservative: assumes double-buffered weights
    #     even if the single-buffer path is taken) ---
    x_bytes = x.dtype.itemsize
    vmem_budget = (
        4 * tile * dim * x_bytes                       # in + out tiles, 2 buffers each
        + 2 * 2 * (dim * hidden + hidden * dim)        # bf16 W1 + W2, 2 buffers
        + 2 * 4 * (hidden + 3 * dim)                   # bias / LN params
        + 4 * tile * hidden * 4                        # f32 h / ReLU intermediates + slack
        + (16 << 20))                                  # headroom
    vmem_limit = int(min(max(vmem_budget, 32 << 20), 112 << 20))

    def call(weight_mode):
        return pl.pallas_call(
            residual_ffn_ln_kernel,
            out_shape=jax.ShapeDtypeStruct((padded_rows, dim), x.dtype),
            grid_spec=pltpu.PrefetchScalarGridSpec(
                num_scalar_prefetch=0,
                grid=grid,
                in_specs=[
                    pl.BlockSpec((tile, dim), lambda i: (i, 0)),   # x row tile
                    _const_spec((dim, hidden), weight_mode),       # W1 (bf16)
                    _const_spec((1, hidden), weight_mode),         # b1
                    _const_spec((hidden, dim), weight_mode),       # W2 (bf16)
                    _const_spec((3, dim), weight_mode),            # [b2; gamma; beta]
                ],
                out_specs=pl.BlockSpec((tile, dim), lambda i: (i, 0)),
            ),
            compiler_params=pltpu.CompilerParams(
                dimension_semantics=("parallel",),
                vmem_limit_bytes=vmem_limit),
        )(x2d, w1b, b1_2d, w2b, packed)

    try:
        # Constant-index inputs -> single-buffer them: halves their VMEM
        # footprint (critical on v7x's 64 MiB VMEM at realistic FFN sizes).
        out2d = call(pl.Buffered(1))
    except Exception:
        # Fallback for toolchains that reject single-buffered pipeline_mode.
        out2d = call(None)

    return out2d[:rows].reshape(m, seq, dim)


def reference_forward_f32(x, w1, b1, w2, b2, gamma, beta, eps=1e-5):
    """Pure-f32 reference (PyTorch eval-mode semantics)."""
    xf = x.astype(jnp.float32)
    h = jnp.maximum(xf @ w1 + b1, 0.0)
    s = h @ w2 + b2
    r = xf + s
    mean = jnp.mean(r, axis=-1, keepdims=True)
    var = jnp.mean((r - mean) ** 2, axis=-1, keepdims=True)
    return (r - mean) * jax.lax.rsqrt(var + eps) * gamma + beta


def reference_forward_bf16_mxu(x, w1, b1, w2, b2, gamma, beta, eps=1e-5):
    """Reference emulating the kernel's recipe: bf16 MXU operands, f32 accumulate."""
    xf = x.astype(jnp.float32)
    h = jnp.dot(xf.astype(jnp.bfloat16), w1.astype(jnp.bfloat16),
                preferred_element_type=jnp.float32) + b1
    h = jnp.maximum(h, 0.0)
    s = jnp.dot(h.astype(jnp.bfloat16), w2.astype(jnp.bfloat16),
                preferred_element_type=jnp.float32) + b2
    r = xf + s
    mean = jnp.mean(r, axis=-1, keepdims=True)
    var = jnp.mean((r - mean) ** 2, axis=-1, keepdims=True)
    return (r - mean) * jax.lax.rsqrt(var + eps) * gamma + beta


if __name__ == "__main__":
    # Small transformer-ish shapes: (m, len, dim) with dim a multiple of 128 so
    # tiles are lane-dense; seq chosen so the row count is NOT a tile multiple
    # (exercises the padding path).
    m, seq, dim, hidden = 3, 100, 128, 256

    key = jax.random.PRNGKey(0)
    kx, k1, k2, k3, k4 = jax.random.split(key, 5)

    x = jax.random.normal(kx, (m, seq, dim), dtype=jnp.float32)
    w1 = jax.random.normal(k1, (dim, hidden), dtype=jnp.float32) * (1.0 / dim) ** 0.5
    b1 = jax.random.normal(k2, (hidden,), dtype=jnp.float32) * 0.01
    w2 = jax.random.normal(k3, (hidden, dim), dtype=jnp.float32) * (1.0 / hidden) ** 0.5
    b2 = jax.random.normal(k4, (dim,), dtype=jnp.float32) * 0.01
    gamma = jnp.ones((dim,), dtype=jnp.float32)
    beta = jnp.zeros((dim,), dtype=jnp.float32)

    out = jax.block_until_ready(residual_forward(x, w1, b1, w2, b2, gamma, beta))
    assert out.shape == (m, seq, dim)

    # Tight check vs a reference using the same bf16-MXU / f32-accumulate recipe.
    ref_mixed = reference_forward_bf16_mxu(x, w1, b1, w2, b2, gamma, beta)
    assert jnp.allclose(out, ref_mixed, atol=1e-3, rtol=1e-3), \
        "mismatch vs mixed-precision reference"

    # Loose check vs the full-f32 module semantics (bf16 operand rounding only).
    ref_f32 = reference_forward_f32(x, w1, b1, w2, b2, gamma, beta)
    assert jnp.allclose(out, ref_f32, atol=5e-2, rtol=5e-2), \
        "mismatch vs f32 reference"

    print("KERNEL_OK")
</pallas_src>

<mosaic_0001>
module attributes {stable_mosaic.version = 11 : i64} {
  func.func @residual_ffn_ln_kernel(%arg0: i32, %arg1: memref<152x128xf32, #tpu.memory_space<vmem>>, %arg2: memref<128x256xbf16, #tpu.memory_space<vmem>>, %arg3: memref<1x256xf32, #tpu.memory_space<vmem>>, %arg4: memref<256x128xbf16, #tpu.memory_space<vmem>>, %arg5: memref<3x128xf32, #tpu.memory_space<vmem>>, %arg6: memref<152x128xf32, #tpu.memory_space<vmem>>) attributes {dimension_semantics = [#tpu.dimension_semantics<parallel>], iteration_bounds = array<i64: 2>, scalar_prefetch = 0 : i64, scratch_operands = 0 : i64, tpu.core_type = #tpu.core_type<tc>, window_params = [{transform_indices = @transform_0, window_bounds = array<i64: 152, 128>}, {pipeline_mode = #tpu.pipeline_mode<synchronous>, transform_indices = @transform_1, window_bounds = array<i64: 128, 256>}, {pipeline_mode = #tpu.pipeline_mode<synchronous>, transform_indices = @transform_2, window_bounds = array<i64: 1, 256>}, {pipeline_mode = #tpu.pipeline_mode<synchronous>, transform_indices = @transform_3, window_bounds = array<i64: 256, 128>}, {pipeline_mode = #tpu.pipeline_mode<synchronous>, transform_indices = @transform_4, window_bounds = array<i64: 3, 128>}, {transform_indices = @transform_5, window_bounds = array<i64: 152, 128>}]} {
    %c0 = arith.constant 0 : index
    %c0_0 = arith.constant 0 : index
    %0 = vector.load %arg1[%c0, %c0_0] : memref<152x128xf32, #tpu.memory_space<vmem>>, vector<152x128xf32>
    %1 = arith.truncf %0 : vector<152x128xf32> to vector<152x128xbf16>
    %c0_1 = arith.constant 0 : index
    %c0_2 = arith.constant 0 : index
    %2 = vector.load %arg2[%c0_1, %c0_2] : memref<128x256xbf16, #tpu.memory_space<vmem>>, vector<128x256xbf16>
    %cst = arith.constant dense<0.000000e+00> : vector<152x256xf32>
    %3 = tpu.matmul %1, %2, %cst {dimension_numbers = #tpu.dot_dimension_numbers<[1], [0], [0], [1], [0, 0, 1, 1], [], []>} : vector<152x128xbf16>, vector<128x256xbf16>, vector<152x256xf32> -> vector<152x256xf32>
    %c0_3 = arith.constant 0 : index
    %c0_4 = arith.constant 0 : index
    %4 = vector.load %arg3[%c0_3, %c0_4] : memref<1x256xf32, #tpu.memory_space<vmem>>, vector<1x256xf32>
    %5 = vector.broadcast %4 : vector<1x256xf32> to vector<152x256xf32>
    %6 = arith.addf %3, %5 : vector<152x256xf32>
    %cst_5 = arith.constant 0.000000e+00 : f32
    %7 = vector.broadcast %cst_5 : f32 to vector<152x256xf32>
    %8 = arith.maximumf %6, %7 : vector<152x256xf32>
    %9 = arith.truncf %8 : vector<152x256xf32> to vector<152x256xbf16>
    %c0_6 = arith.constant 0 : index
    %c0_7 = arith.constant 0 : index
    %10 = vector.load %arg4[%c0_6, %c0_7] : memref<256x128xbf16, #tpu.memory_space<vmem>>, vector<256x128xbf16>
    %cst_8 = arith.constant dense<0.000000e+00> : vector<152x128xf32>
    %11 = tpu.matmul %9, %10, %cst_8 {dimension_numbers = #tpu.dot_dimension_numbers<[1], [0], [0], [1], [0, 0, 1, 1], [], []>} : vector<152x256xbf16>, vector<256x128xbf16>, vector<152x128xf32> -> vector<152x128xf32>
    %c0_9 = arith.constant 0 : index
    %c0_10 = arith.constant 0 : index
    %12 = vector.load %arg5[%c0_9, %c0_10] : memref<3x128xf32, #tpu.memory_space<vmem>>, vector<3x128xf32>
    %13 = vector.extract_strided_slice %12 {offsets = [0, 0], sizes = [1, 128], strides = [1, 1]} : vector<3x128xf32> to vector<1x128xf32>
    %14 = vector.broadcast %13 : vector<1x128xf32> to vector<152x128xf32>
    %15 = arith.addf %11, %14 : vector<152x128xf32>
    %16 = arith.addf %0, %15 : vector<152x128xf32>
    %cst_11 = arith.constant dense<0.000000e+00> : vector<152xf32>
    %17 = vector.multi_reduction <add>, %16, %cst_11 [1] : vector<152x128xf32> to vector<152xf32>
    %18 = vector.shape_cast %17 : vector<152xf32> to vector<152x1xf32>
    %cst_12 = arith.constant 1.280000e+02 : f32
    %19 = vector.broadcast %cst_12 : f32 to vector<152x1xf32>
    %20 = arith.divf %18, %19 : vector<152x1xf32>
    %21 = vector.broadcast %20 : vector<152x1xf32> to vector<152x128xf32>
    %22 = arith.subf %16, %21 : vector<152x128xf32>
    %23 = arith.mulf %22, %22 : vector<152x128xf32>
    %cst_13 = arith.constant dense<0.000000e+00> : vector<152xf32>
    %24 = vector.multi_reduction <add>, %23, %cst_13 [1] : vector<152x128xf32> to vector<152xf32>
    %25 = vector.shape_cast %24 : vector<152xf32> to vector<152x1xf32>
    %cst_14 = arith.constant 1.280000e+02 : f32
    %26 = vector.broadcast %cst_14 : f32 to vector<152x1xf32>
    %27 = arith.divf %25, %26 : vector<152x1xf32>
    %cst_15 = arith.constant 9.99999974E-6 : f32
    %28 = vector.broadcast %cst_15 : f32 to vector<152x1xf32>
    %29 = arith.addf %27, %28 : vector<152x1xf32>
    %30 = math.rsqrt %29 : vector<152x1xf32>
    %31 = vector.broadcast %30 : vector<152x1xf32> to vector<152x128xf32>
    %32 = arith.mulf %22, %31 : vector<152x128xf32>
    %33 = vector.extract_strided_slice %12 {offsets = [1, 0], sizes = [1, 128], strides = [1, 1]} : vector<3x128xf32> to vector<1x128xf32>
    %34 = vector.broadcast %33 : vector<1x128xf32> to vector<152x128xf32>
    %35 = arith.mulf %32, %34 : vector<152x128xf32>
    %36 = vector.extract_strided_slice %12 {offsets = [2, 0], sizes = [1, 128], strides = [1, 1]} : vector<3x128xf32> to vector<1x128xf32>
    %37 = vector.broadcast %36 : vector<1x128xf32> to vector<152x128xf32>
    %38 = arith.addf %35, %37 : vector<152x128xf32>
    %c0_16 = arith.constant 0 : index
    %c0_17 = arith.constant 0 : index
    %39 = vector.load %arg6[%c0_16, %c0_17] : memref<152x128xf32, #tpu.memory_space<vmem>>, vector<152x128xf32>
    tpu.vector_store %arg6[%c0_16, %c0_17], %38 {strides = array<i32>} : memref<152x128xf32, #tpu.memory_space<vmem>>, vector<152x128xf32>,
    return
  }
  func.func @transform_0(%arg0: i32) -> (i32, i32) {
    %c0_i32 = arith.constant 0 : i32
    %c0_i32_0 = arith.constant 0 : i32
    return %arg0, %c0_i32 : i32, i32
  }
  func.func @transform_1(%arg0: i32) -> (i32, i32) {
    %c0_i32 = arith.constant 0 : i32
    %c0_i32_0 = arith.constant 0 : i32
    %c0_i32_1 = arith.constant 0 : i32
    return %c0_i32, %c0_i32_0 : i32, i32
  }
  func.func @transform_2(%arg0: i32) -> (i32, i32) {
    %c0_i32 = arith.constant 0 : i32
    %c0_i32_0 = arith.constant 0 : i32
    %c0_i32_1 = arith.constant 0 : i32
    return %c0_i32, %c0_i32_0 : i32, i32
  }
  func.func @transform_3(%arg0: i32) -> (i32, i32) {
    %c0_i32 = arith.constant 0 : i32
    %c0_i32_0 = arith.constant 0 : i32
    %c0_i32_1 = arith.constant 0 : i32
    return %c0_i32, %c0_i32_0 : i32, i32
  }
  func.func @transform_4(%arg0: i32) -> (i32, i32) {
    %c0_i32 = arith.constant 0 : i32
    %c0_i32_0 = arith.constant 0 : i32
    %c0_i32_1 = arith.constant 0 : i32
    return %c0_i32, %c0_i32_0 : i32, i32
  }
  func.func @transform_5(%arg0: i32) -> (i32, i32) {
    %c0_i32 = arith.constant 0 : i32
    %c0_i32_0 = arith.constant 0 : i32
    return %arg0, %c0_i32 : i32, i32
  }
}

module attributes {stable_mosaic.version = 11 : i64} {
  func.func @residual_ffn_ln_kernel(%arg0: i32, %arg1: memref<152x128xf32, #tpu.memory_space<vmem>>, %arg2: memref<128x256xbf16, #tpu.memory_space<vmem>>, %arg3: memref<1x256xf32, #tpu.memory_space<vmem>>, %arg4: memref<256x128xbf16, #tpu.memory_space<vmem>>, %arg5: memref<3x128xf32, #tpu.memory_space<vmem>>, %arg6: memref<152x128xf32, #tpu.memory_space<vmem>>) attributes {dimension_semantics = [#tpu.dimension_semantics<parallel>], iteration_bounds = array<i64: 2>, scalar_prefetch = 0 : i64, scratch_operands = 0 : i64, tpu.core_type = #tpu.core_type<tc>, window_params = [{transform_indices = @transform_0, window_bounds = array<i64: 152, 128>}, {pipeline_mode = #tpu.pipeline_mode<synchronous>, transform_indices = @transform_1, window_bounds = array<i64: 128, 256>}, {pipeline_mode = #tpu.pipeline_mode<synchronous>, transform_indices = @transform_2, window_bounds = array<i64: 1, 256>}, {pipeline_mode = #tpu.pipeline_mode<synchronous>, transform_indices = @transform_3, window_bounds = array<i64: 256, 128>}, {pipeline_mode = #tpu.pipeline_mode<synchronous>, transform_indices = @transform_4, window_bounds = array<i64: 3, 128>}, {transform_indices = @transform_5, window_bounds = array<i64: 152, 128>}]} {
    %c0 = arith.constant 0 : index
    %c0_0 = arith.constant 0 : index
    %0 = vector.load %arg1[%c0, %c0_0] : memref<152x128xf32, #tpu.memory_space<vmem>>, vector<152x128xf32>
    %1 = arith.truncf %0 : vector<152x128xf32> to vector<152x128xbf16>
    %c0_1 = arith.constant 0 : index
    %c0_2 = arith.constant 0 : index
    %2 = vector.load %arg2[%c0_1, %c0_2] : memref<128x256xbf16, #tpu.memory_space<vmem>>, vector<128x256xbf16>
    %cst = arith.constant dense<0.000000e+00> : vector<152x256xf32>
    %3 = tpu.matmul %1, %2, %cst {dimension_numbers = #tpu.dot_dimension_numbers<[1], [0], [0], [1], [0, 0, 1, 1], [], []>} : vector<152x128xbf16>, vector<128x256xbf16>, vector<152x256xf32> -> vector<152x256xf32>
    %c0_3 = arith.constant 0 : index
    %c0_4 = arith.constant 0 : index
    %4 = vector.load %arg3[%c0_3, %c0_4] : memref<1x256xf32, #tpu.memory_space<vmem>>, vector<1x256xf32>
    %5 = vector.broadcast %4 : vector<1x256xf32> to vector<152x256xf32>
    %6 = arith.addf %3, %5 : vector<152x256xf32>
    %cst_5 = arith.constant 0.000000e+00 : f32
    %7 = vector.broadcast %cst_5 : f32 to vector<152x256xf32>
    %8 = arith.maximumf %6, %7 : vector<152x256xf32>
    %9 = arith.truncf %8 : vector<152x256xf32> to vector<152x256xbf16>
    %c0_6 = arith.constant 0 : index
    %c0_7 = arith.constant 0 : index
    %10 = vector.load %arg4[%c0_6, %c0_7] : memref<256x128xbf16, #tpu.memory_space<vmem>>, vector<256x128xbf16>
    %cst_8 = arith.constant dense<0.000000e+00> : vector<152x128xf32>
    %11 = tpu.matmul %9, %10, %cst_8 {dimension_numbers = #tpu.dot_dimension_numbers<[1], [0], [0], [1], [0, 0, 1, 1], [], []>} : vector<152x256xbf16>, vector<256x128xbf16>, vector<152x128xf32> -> vector<152x128xf32>
    %c0_9 = arith.constant 0 : index
    %c0_10 = arith.constant 0 : index
    %12 = vector.load %arg5[%c0_9, %c0_10] : memref<3x128xf32, #tpu.memory_space<vmem>>, vector<3x128xf32>
    %13 = vector.extract_strided_slice %12 {offsets = [0, 0], sizes = [1, 128], strides = [1, 1]} : vector<3x128xf32> to vector<1x128xf32>
    %14 = vector.broadcast %13 : vector<1x128xf32> to vector<152x128xf32>
    %15 = arith.addf %11, %14 : vector<152x128xf32>
    %16 = arith.addf %0, %15 : vector<152x128xf32>
    %cst_11 = arith.constant dense<0.000000e+00> : vector<152xf32>
    %17 = vector.multi_reduction <add>, %16, %cst_11 [1] : vector<152x128xf32> to vector<152xf32>
    %18 = vector.shape_cast %17 : vector<152xf32> to vector<152x1xf32>
    %cst_12 = arith.constant 1.280000e+02 : f32
    %19 = vector.broadcast %cst_12 : f32 to vector<152x1xf32>
    %20 = arith.divf %18, %19 : vector<152x1xf32>
    %21 = vector.broadcast %20 : vector<152x1xf32> to vector<152x128xf32>
    %22 = arith.subf %16, %21 : vector<152x128xf32>
    %23 = arith.mulf %22, %22 : vector<152x128xf32>
    %cst_13 = arith.constant dense<0.000000e+00> : vector<152xf32>
    %24 = vector.multi_reduction <add>, %23, %cst_13 [1] : vector<152x128xf32> to vector<152xf32>
    %25 = vector.shape_cast %24 : vector<152xf32> to vector<152x1xf32>
    %cst_14 = arith.constant 1.280000e+02 : f32
    %26 = vector.broadcast %cst_14 : f32 to vector<152x1xf32>
    %27 = arith.divf %25, %26 : vector<152x1xf32>
    %cst_15 = arith.constant 9.99999974E-6 : f32
    %28 = vector.broadcast %cst_15 : f32 to vector<152x1xf32>
    %29 = arith.addf %27, %28 : vector<152x1xf32>
    %30 = math.rsqrt %29 : vector<152x1xf32>
    %31 = vector.broadcast %30 : vector<152x1xf32> to vector<152x128xf32>
    %32 = arith.mulf %22, %31 : vector<152x128xf32>
    %33 = vector.extract_strided_slice %12 {offsets = [1, 0], sizes = [1, 128], strides = [1, 1]} : vector<3x128xf32> to vector<1x128xf32>
    %34 = vector.broadcast %33 : vector<1x128xf32> to vector<152x128xf32>
    %35 = arith.mulf %32, %34 : vector<152x128xf32>
    %36 = vector.extract_strided_slice %12 {offsets = [2, 0], sizes = [1, 128], strides = [1, 1]} : vector<3x128xf32> to vector<1x128xf32>
    %37 = vector.broadcast %36 : vector<1x128xf32> to vector<152x128xf32>
    %38 = arith.addf %35, %37 : vector<152x128xf32>
    %c0_16 = arith.constant 0 : index
    %c0_17 = arith.constant 0 : index
    %39 = vector.load %arg6[%c0_16, %c0_17] : memref<152x128xf32, #tpu.memory_space<vmem>>, vector<152x128xf32>
    tpu.vector_store %arg6[%c0_16, %c0_17], %38 {strides = array<i32>} : memref<152x128xf32, #tpu.memory_space<vmem>>, vector<152x128xf32>,
    return
  }
  func.func @transform_0(%arg0: i32) -> (i32, i32) {
    %c0_i32 = arith.constant 0 : i32
    %c0_i32_0 = arith.constant 0 : i32
    return %arg0, %c0_i32 : i32, i32
  }
  func.func @transform_1(%arg0: i32) -> (i32, i32) {
    %c0_i32 = arith.constant 0 : i32
    %c0_i32_0 = arith.constant 0 : i32
    %c0_i32_1 = arith.constant 0 : i32
    return %c0_i32, %c0_i32_0 : i32, i32
  }
  func.func @transform_2(%arg0: i32) -> (i32, i32) {
    %c0_i32 = arith.constant 0 : i32
    %c0_i32_0 = arith.constant 0 : i32
    %c0_i32_1 = arith.constant 0 : i32
    return %c0_i32, %c0_i32_0 : i32, i32
  }
  func.func @transform_3(%arg0: i32) -> (i32, i32) {
    %c0_i32 = arith.constant 0 : i32
    %c0_i32_0 = arith.constant 0 : i32
    %c0_i32_1 = arith.constant 0 : i32
    return %c0_i32, %c0_i32_0 : i32, i32
  }
  func.func @transform_4(%arg0: i32) -> (i32, i32) {
    %c0_i32 = arith.constant 0 : i32
    %c0_i32_0 = arith.constant 0 : i32
    %c0_i32_1 = arith.constant 0 : i32
    return %c0_i32, %c0_i32_0 : i32, i32
  }
  func.func @transform_5(%arg0: i32) -> (i32, i32) {
    %c0_i32 = arith.constant 0 : i32
    %c0_i32_0 = arith.constant 0 : i32
    return %arg0, %c0_i32 : i32, i32
  }
}

</mosaic_0001>

<bundles_post_ra>
// kernel: tpu_custom_call.1
= control target key start
LH: loop header
LB: loop body
LE: loop exit
PB: predicated region body
PF: predicated region fallthrough
CT: control target
= control target key end

     0   :  { %10 = vsyncpa [#allocation3], 0  ;;  %s2395_s0 = inlined_call_operand.hbm [shape: f32[304,128], index: 0, kind: input, shape index: {}]   ;;  %s2396_s1 = inlined_call_operand.hbm [shape: bf16[128,256], index: 1, kind: input, shape index: {}]   ;;  %s2397_s2 = inlined_call_operand.vmem [shape: f32[1,256], index: 2, kind: input, shape index: {}]   ;;  %s2398_s3 = inlined_call_operand.hbm [shape: bf16[256,128], index: 3, kind: input, shape index: {}]   ;;  %s2399_s4 = inlined_call_operand.vmem [shape: f32[3,128], index: 4, kind: input, shape index: {}]   ;;  %s2400_s5 = inlined_call_operand.hbm [shape: f32[304,128], index: 5, kind: output, shape index: {}]  }
   0x1   :  { %12 = vsyncpa [#allocation3 + $0x1], 0 }
   0x2   :  { %13 = vsyncpa [#allocation6], 0 }
   0x3   :  { %14 = vsyncpa [#allocation4], 0 }
   0x4   :  { %16 = vsyncpa [#allocation4 + $0x1], 0  ;;  %s1721_s18 = smov 0   ;;  %s1723_s19 = smov 0  }
   0x5   :  { %s1725_s20 = smov 0   ;;  %s1727_s21 = smov 0  }
   0x6 LB: > { %s1742_s22 = sadd.s32 4294967295, %s1678_s21   ;;  %s1246_s23 = sadd.s32 4294967294, %s1678_s21   ;;  %s1678_s21 = sphi %s1727_s21, %s2422_s21   ;;  %s1674_s20 = sphi %s1725_s20, %s2421_s20   ;;  %s1670_s19 = sphi %s1723_s19, %s2420_s19   ;;  %s1666_s18 = sphi %s1721_s18, %s2419_s18  }
   0x7   : > { %p42_p0 = scmp.ne.s32.totalorder %s1670_s19, %s1666_s18  ;;  %p2401_p1 = scmp.eq.s32.totalorder %s1742_s22, 0 }
   0x8   : > { %p156_p3 = scmp.eq.s32.totalorder %s1246_s23, 1  ;;  %p1247_p5 = scmp.ge.s32.totalorder %s1678_s21, 1 }
   0x9   : > { %p1751_p4 = por %p2401_p1, %p42_p0  ;;  %p163_p7 = scmp.lt.s32.totalorder %s1678_s21, 3 }
   0xa   : > { %p1756_p6 = por %p156_p3, %p42_p0  ;;  %s1680_s27 = smov [#allocation5]  }
   0xb   : > { %s2405_s24 = scalar_select %p1751_p4, 1, 0 }
   0xc   : > { %s2406_s25 = scalar_select %p1756_p6, 1, 0 }
   0xd   : > { %p1761_p8 = pnand %p1247_p5, %p163_p7  ;;  %s175_s28 = sshll.u32 %s1680_s27, 4  ;;  %s1765_s28 = int_to_ptr.vmem [resolvable:$true] %s175_s28 }
   0xe   : > { %s1681_s30 = smov [#allocation7]   ;;  %s1522_s9 = scalar_lea.hbm %s2396_s1, 2048 }
   0xf   : > { %p1382_p9 = pneg %p1761_p8  ;;  %s191_s6 = sshll.u32 %s1681_s30, 4  ;;  %s1776_s6 = int_to_ptr.vmem [resolvable:$true] %s191_s6 }
  0x10   : > { %p1523_p12 = scmp.ne.s32.totalorder %s2396_s1, %s1522_s9  ;;  %p1529_p5 = scmp.lt.u32.totalorder %s1522_s9, %s2396_s1 }
  0x11   : > { %p1772_p11 = pnand %p1382_p9, %p2401_p1 }
  0x13   : > { %p1524_p13 = pneg %p1772_p11 }
  0x15   : > { %p1525_p0 = pnand %p1524_p13, %p1523_p12 }
  0x17   : > { %p1526_p3 = pneg %p1525_p0 }
  0x19   : > { %p1531_p7 = pnand %p1529_p5, %p1526_p3 }
  0x1b   : > { %1534 = shalt.err (!%p1531_p7)
}
  0x1c   : > { %s1535_s14 = scalar_lea.vmem %s1765_s28, 2048  ;;  %p1543_p2 = scmp.lt.s32.totalorder %s1765_s28, %s1765_s28 }
  0x1d   : > { %p1536_p9 = scmp.ne.s32.totalorder %s1765_s28, %s1535_s14  ;;  %p1544_p12 = scmp.lt.s32.totalorder %s1535_s14, %s1535_s14 }
  0x1f   : > { %p1538_p10 = pnand %p1536_p9, %p1524_p13  ;;  %p1545_p0 = por %p1544_p12, %p1543_p2 }
  0x21   : > { %p1539_p1 = pneg %p1538_p10 }
  0x23   : > { %p1546_p6 = pnand %p1545_p0, %p1539_p1 }
  0x25   : > { %1549 = shalt.err (!%p1546_p6)
}
  0x26   : > { %s2402_s15 = smov 128   ;;  %s1683_s16 = smov 8  }
  0x27   : > { %1385 = dma.hbm_to_vmem [thread:$0]  (!%p1772_p11), %s2396_s1, 2048, %s1765_s28, [#allocation6], %s2402_s15, %s2402_s15, %s1683_s16  }
  0x28   : > { %s1550_s7 = scalar_lea.hbm %s2398_s3, 2048 }
  0x29   : > { %p1551_p1 = scmp.ne.s32.totalorder %s2398_s3, %s1550_s7  ;;  %p1557_p10 = scmp.lt.u32.totalorder %s1550_s7, %s2398_s3 }
  0x2b   : > { %p1553_p2 = pnand %p1551_p1, %p1524_p13 }
  0x2d   : > { %p1554_p6 = pneg %p1553_p2 }
  0x2f   : > { %p1559_p3 = pnand %p1557_p10, %p1554_p6 }
  0x31   : > { %1562 = shalt.err (!%p1559_p3)
}
  0x32   : > { %s1563_s28 = scalar_lea.vmem %s1776_s6, 2048  ;;  %p1571_p12 = scmp.lt.s32.totalorder %s1776_s6, %s1776_s6 }
  0x33   : > { %p1564_p5 = scmp.ne.s32.totalorder %s1776_s6, %s1563_s28  ;;  %p1572_p0 = scmp.lt.s32.totalorder %s1563_s28, %s1563_s28 }
  0x35   : > { %p1566_p7 = pnand %p1564_p5, %p1524_p13  ;;  %p1573_p1 = por %p1572_p0, %p1571_p12 }
  0x37   : > { %p1567_p9 = pneg %p1566_p7 }
  0x39   : > { %p1574_p2 = pnand %p1573_p1, %p1567_p9 }
  0x3b   : > { %1577 = shalt.err (!%p1574_p2)
}
  0x3c   : > { %s1684_s12 = smov 64   ;;  %s1685_s13 = smov 4  }
  0x3d   : > { %1388 = dma.hbm_to_vmem [thread:$0]  (!%p1772_p11), %s2398_s3, 2048, %s1776_s6, [#allocation6], %s1684_s12, %s1684_s12, %s1685_s13  }
  0x3e   : > { %s1834_s23 = sadd.s32 1, %s1678_s21   ;;  %s29_s30 = sadd.s32 1, %s1674_s20 }
  0x3f   : > { %s26_s27 = ssub.s32 %s1678_s21, %s1834_s23  ;;  %p36_p6 = scmp.ne.s32.totalorder %s1674_s20, %s1670_s19 }
  0x40   : > { %p27_p13 = scmp.eq.s32.totalorder %s26_s27, 0  ;;  %p37_p10 = scmp.eq.s32.totalorder %s1678_s21, 0 }
  0x41   : > { %p2409_p5 = scmp.eq.s32.totalorder %s1742_s22, 1  ;;  %p1399_p9 = scmp.lt.s32.totalorder %s1678_s21, 2 }
  0x42   : > { %s1843_s7 = scalar_select %p27_p13, %s1674_s20, %s29_s30  }
  0x43   : > { %p38_p3 = por %p37_p10, %p36_p6  ;;  %p1847_p7 = por %p2409_p5, %p36_p6 }
  0x44   : > { %s208_s29 = sand.u32 1, %s1674_s20   ;;  %s1290_s6 = smul.u32 2432, %s1678_s21 }
  0x45   : > { %s2410_s8 = scalar_select %p1847_p7, 1, 0 }
  0x46   : > { %s1368_s9 = smul.u32 152, %s208_s29  ;;  %p1854_p11 = pnand %p1399_p9, %p38_p3 }
  0x47   : > { %s1861_s12 = scalar_lea.hbm %s2395_s0, %s1290_s6  ;;  %s1865_s17 = scalar_lea.sflag [#allocation3], %s208_s29 }
  0x48   : > { %s212_s13 = scalar_lea.vmem [#allocation2], %s1368_s9  ;;  %s1578_s27 = scalar_lea.hbm %s1861_s12, 2432 }
  0x49   : > { %s219_s14 = sshll.u32 %s212_s13, 4  ;;  %p1579_p12 = scmp.ne.s32.totalorder %s1861_s12, %s1578_s27  ;;  %s1863_s14 = int_to_ptr.vmem [resolvable:$true] %s219_s14 }
  0x4a   : > { %p1580_p0 = pneg %p1854_p11  ;;  %s1583_s11 = scalar_lea.hbm %s2395_s0, 4864 }
  0x4b   : > { %p1584_p13 = scmp.lt.u32.totalorder %s1861_s12, %s2395_s0  ;;  %p1585_p6 = scmp.lt.u32.totalorder %s1583_s11, %s1578_s27 }
  0x4c   : > { %p1581_p1 = pnand %p1580_p0, %p1579_p12  ;;  %p1587_p3 = scmp.lt.u32.totalorder %s1578_s27, %s1861_s12 }
  0x4d   : > { %p1586_p10 = por %p1585_p6, %p1584_p13 }
  0x4e   : > { %p1582_p2 = pneg %p1581_p1 }
  0x4f   : > { %p1588_p5 = por %p1587_p3, %p1586_p10 }
  0x51   : > { %p1589_p9 = pnand %p1588_p5, %p1582_p2 }
  0x53   : > { %1592 = shalt.err (!%p1589_p9)
}
  0x54   : > { %s1593_s29 = scalar_lea.vmem %s1863_s14, 2432  ;;  %s1686_s9 = smov [#allocation2]  }
  0x55   : > { %p1594_p12 = scmp.ne.s32.totalorder %s1863_s14, %s1593_s29  ;;  %s1598_s13 = sshll.u32 %s1686_s9, 4  ;;  %s1599_s13 = int_to_ptr.vmem [resolvable:$false] %s1598_s13 }
  0x56   : > { %s1600_s15 = scalar_lea.vmem %s1599_s13, 4864  ;;  %p1601_p4 = scmp.lt.s32.totalorder %s1863_s14, %s1599_s13 }
  0x57   : > { %p1596_p1 = pnand %p1594_p12, %p1580_p0  ;;  %p1602_p13 = scmp.lt.s32.totalorder %s1600_s15, %s1593_s29 }
  0x59   : > { %p1597_p7 = pneg %p1596_p1  ;;  %p1603_p6 = por %p1602_p13, %p1601_p4 }
  0x5b   : > { %p1604_p10 = pnand %p1603_p6, %p1597_p7 }
  0x5d   : > { %1607 = shalt.err (!%p1604_p10)
}
  0x5e   : > { %s2412_s27 = smov 128   ;;  %231 = sbr.rel (%p1761_p8) target bundleno = 977 (0x3d1), region = 40 }
  0x5f   : > { %1392 = dma.hbm_to_vmem [thread:$0]  (!%p1854_p11), %s1861_s12, 2432, %s1863_s14, %s1865_s17, %s2412_s27, %s2412_s27, %s1683_s16  }
  0x60   : > { %s1899_s30 = sand.u32 (!%p1761_p8), 1, %s1670_s19   ;;  %p2413_p4 = scmp.ne.s32.totalorder (!%p1761_p8), %s2405_s24, 0 }
  0x61   : > { %s1369_s6 = smul.u32 (!%p1761_p8), 152, %s1899_s30  ;;  %s234_s11 = scalar_lea.sflag (!%p1761_p8), [#allocation3], %s1899_s30 }
  0x63   : > { %s1905_s10 = scalar_lea.vmem (!%p1761_p8), [#allocation2], %s1369_s6 }
  0x65   : > { %1653 = dma.done.wait (%p2413_p4), %s234_s11, 2432  }
  0x66   : > { %1655 = vsyncadd (%p2413_p4), %s234_s11, 4294964864  ;;  %p2414_p7 = scmp.eq.s32.totalorder %s1742_s22, 0 }
  0x68   : > { %1657 = dma.done.wait (%p2414_p7), [#allocation6], 4096   ;;  %p2415_p8 = pmov %p2414_p7 }
  0x69   : > { %v1687_v0 = vmov 0   ;;  %v1444_v1 = vld [vmem:[#allocation5 + $0x4] ss:$8 sps:$4 sm:$0xff]   ;;  %v1446_v2 = vld [vmem:[#allocation5] ss:$8 sps:$4 sm:$0xff]   ;;  %v1472_v18 = vld [vmem:[#allocation7 + $0x50] sm:$0xff]   ;;  %v322_v62 = vlaneseq }
  0x6a   : > { %1659 = vsyncadd (%p2415_p8), [#allocation6], 4294963200  ;;  %444 = vmatprep.mubr.bf16.mxu0 %v1687_v0  ;;  %412 = vmatprep.subr.bf16.mxu0 %v1444_v1  ;;  %v1447_v3 = vld [vmem:[#allocation5 + $0x14] ss:$8 sps:$4 sm:$0xff]   ;;  %v1449_v4 = vld [vmem:[#allocation5 + $0x10] ss:$8 sps:$4 sm:$0xff]  }
  0x6b   : > { %413 = vmatpush1.bf16.msra.mxu0 %v1446_v2  ;;  %v1450_v5 = vld [vmem:[#allocation5 + $0x24] ss:$8 sps:$4 sm:$0xff]   ;;  %v1452_v6 = vld [vmem:[#allocation5 + $0x20] ss:$8 sps:$4 sm:$0xff]   ;;  %v1453_v7 = vld [vmem:[#allocation5 + $0x34] ss:$8 sps:$4 sm:$0xff]  }
  0x6c   : > { %414 = vmatprep.subr.bf16.mxu0 %v1447_v3  ;;  %v1455_v8 = vld [vmem:[#allocation5 + $0x30] ss:$8 sps:$4 sm:$0xff]   ;;  %v1456_v9 = vld [vmem:[#allocation5 + $0x44] ss:$8 sps:$4 sm:$0xff]   ;;  %v1458_v10 = vld [vmem:[#allocation5 + $0x40] ss:$8 sps:$4 sm:$0xff]  }
  0x6d   : > { %v1459_v11 = vld [vmem:[#allocation5 + $0x54] ss:$8 sps:$4 sm:$0xff]   ;;  %v1461_v12 = vld [vmem:[#allocation5 + $0x50] ss:$8 sps:$4 sm:$0xff]   ;;  %v1468_v13 = vld [vmem:[#allocation7 + $0x40] sm:$0xff]   ;;  %v2002_v63 = vshrl.u32 %v322_v62, 7 }
  0x6e   : > { %v1462_v14 = vld [vmem:[#allocation5 + $0x64] ss:$8 sps:$4 sm:$0xff]   ;;  %1292 = vmatprep.subr.bf16.mxu1 %v1468_v13  ;;  %v1464_v19 = vld [vmem:[#allocation5 + $0x60] ss:$8 sps:$4 sm:$0xff]   ;;  %v1465_v20 = vld [vmem:[#allocation5 + $0x74] ss:$8 sps:$4 sm:$0xff]  }
  0x6f   : > { %415 = vmatpush1.bf16.msra.mxu0 %v1449_v4  ;;  %v1469_v15 = vld [vmem:[#allocation7] sm:$0xff]   ;;  %v1470_v16 = vld [vmem:[#allocation7 + $0x48] sm:$0xff]   ;;  %v1473_v21 = vld [vmem:[#allocation7 + $0x10] sm:$0xff]   ;;  %v328_v2 = vsub.s32 1, %v2002_v63  ;;  %s2270_s14 = scalar_lea.vmem [#allocation8], %s1369_s6  ;;  %s1291_s17 = smul.u32 2432, %s1742_s22 }
  0x70   : > { %416 = vmatprep.subr.bf16.mxu0 %v1450_v5  ;;  %1293 = vmatpush3.bf16.msra.mxu1 %v1469_v15  ;;  %v1471_v17 = vld [vmem:[#allocation7 + $0x8] sm:$0xff]   ;;  %v1467_v22 = vld [vmem:[#allocation5 + $0x70] ss:$8 sps:$4 sm:$0xff]   ;;  %v1476_v27 = vld [vmem:[#allocation7 + $0x60] sm:$0xff]   ;;  %s1154_s28 = sshll.u32 %s2270_s14, 4  ;;  %s1141_s22 = scalar_lea.sflag [#allocation4], %s1899_s30  ;;  %s2349_s28 = int_to_ptr.vmem [resolvable:$true] %s1154_s28 }
  0x71   : > { %1294 = vmatprep.subr.bf16.mxu1 %v1470_v16  ;;  %v1917_v23 = vld [vmem:[%s1905_s10] sm:$0xff]  ;;  %v1474_v24 = vld [vmem:[#allocation7 + $0x58] sm:$0xff]   ;;  %v1477_v29 = vld [vmem:[#allocation7 + $0x20] sm:$0xff]   ;;  %s2347_s13 = scalar_lea.hbm %s2400_s5, %s1291_s17  ;;  %s1608_s15 = scalar_lea.vmem %s2349_s28, 2432 }
  0x72   : > { %v1920_v25 = vld [vmem:[%s1905_s10 + $0x8] sm:$0xff]  ;;  %v1478_v30 = vld [vmem:[#allocation7 + $0x68] sm:$0xff]   ;;  %v1926_v31 = vld [vmem:[%s1905_s10 + $0x10] sm:$0xff]  ;;  %p1609_p11 = scmp.ne.s32.totalorder %s2349_s28, %s1608_s15  ;;  %p2416_p0 = scmp.ne.s32.totalorder %s2410_s8, 0 }
  0x73   : > { %417 = vmatpush1.bf16.msra.mxu0 %v1452_v6  ;;  %v1475_v26 = vld [vmem:[#allocation7 + $0x18] sm:$0xff]   ;;  %v294_v28 = vpack.c.bf16 %v1920_v25, %v1917_v23  ;;  %v1929_v32 = vld [vmem:[%s1905_s10 + $0x18] sm:$0xff]  ;;  %v1935_v34 = vld [vmem:[%s1905_s10 + $0x20] sm:$0xff]  ;;  %s1688_s27 = smov [#allocation8]  }
  0x74   : > { %418 = vmatprep.subr.bf16.mxu0 %v1453_v7  ;;  %1295 = vmatpush3.bf16.msra.mxu1 %v1471_v17  ;;  %v295_v33 = vpack.c.bf16 %v1929_v32, %v1926_v31  ;;  %v1938_v35 = vld [vmem:[%s1905_s10 + $0x28] sm:$0xff]  ;;  %v1944_v37 = vld [vmem:[%s1905_s10 + $0x30] sm:$0xff]  ;;  %v1947_v38 = vld [vmem:[%s1905_s10 + $0x38] sm:$0xff]  ;;  %p1610_p2 = pnand %p1609_p11, %p2416_p0  ;;  %s1612_s6 = sshll.u32 %s1688_s27, 4  ;;  %s1613_s6 = int_to_ptr.vmem [resolvable:$false] %s1612_s6 }
  0x75   : > { %1296 = vmatprep.subr.bf16.mxu1 %v1472_v18  ;;  %v296_v36 = vpack.c.bf16 %v1938_v35, %v1935_v34  ;;  %v297_v39 = vpack.c.bf16 %v1947_v38, %v1944_v37  ;;  %v1953_v40 = vld [vmem:[%s1905_s10 + $0x40] sm:$0xff]  ;;  %v1956_v41 = vld [vmem:[%s1905_s10 + $0x48] sm:$0xff]  ;;  %v1962_v43 = vld [vmem:[%s1905_s10 + $0x50] sm:$0xff]  ;;  %s1614_s11 = scalar_lea.vmem %s1613_s6, 4864  ;;  %p1615_p5 = scmp.lt.s32.totalorder %s2349_s28, %s1613_s6 }
  0x76   : > { %v298_v42 = vpack.c.bf16 %v1956_v41, %v1953_v40  ;;  %v1965_v44 = vld [vmem:[%s1905_s10 + $0x58] sm:$0xff]  ;;  %v1971_v46 = vld [vmem:[%s1905_s10 + $0x60] sm:$0xff]  ;;  %v1974_v47 = vld [vmem:[%s1905_s10 + $0x68] sm:$0xff]  ;;  %p1611_p3 = pneg %p1610_p2  ;;  %p1616_p9 = scmp.lt.s32.totalorder %s1614_s11, %s1608_s15 }
  0x77   : > { %419 = vmatpush1.bf16.msra.mxu0 %v1455_v8  ;;  %v299_v45 = vpack.c.bf16 %v1965_v44, %v1962_v43  ;;  %v300_v48 = vpack.c.bf16 %v1974_v47, %v1971_v46  ;;  %v1980_v49 = vld [vmem:[%s1905_s10 + $0x70] sm:$0xff]  ;;  %v1983_v50 = vld [vmem:[%s1905_s10 + $0x78] sm:$0xff]  ;;  %v1989_v52 = vld [vmem:[%s1905_s10 + $0x80] sm:$0xff] }
  0x78   : > { %420 = vmatprep.subr.bf16.mxu0 %v1456_v9  ;;  %1297 = vmatpush3.bf16.msra.mxu1 %v1473_v21  ;;  %v301_v51 = vpack.c.bf16 %v1983_v50, %v1980_v49  ;;  %v1992_v53 = vld [vmem:[%s1905_s10 + $0x88] sm:$0xff]  ;;  %v1998_v55 = vld [vmem:[%s1905_s10 + $0x90] sm:$0xff]  ;;  %v1479_v57 = vld [vmem:[#allocation7 + $0x28] sm:$0xff]   ;;  %p1617_p12 = por %p1616_p9, %p1615_p5 }
  0x79   : > { %1298 = vmatprep.subr.bf16.mxu1 %v1474_v24  ;;  %v302_v54 = vpack.c.bf16 %v1992_v53, %v1989_v52  ;;  %v303_v56 = vpack.c.bf16 %v1998_v55, %v1998_v55  ;;  %v1480_v58 = vld [vmem:[#allocation7 + $0x70] sm:$0xff]   ;;  %v1482_v60 = vld [vmem:[#allocation7 + $0x78] sm:$0xff]  }
  0x7a   : > { %v1481_v59 = vld [vmem:[#allocation7 + $0x30] sm:$0xff]   ;;  %v1483_v61 = vld [vmem:[#allocation7 + $0x38] sm:$0xff]   ;;  %p1618_p1 = pnand %p1617_p12, %p1611_p3 }
  0x7b   : > { %421 = vmatpush1.bf16.msra.mxu0 %v1458_v10  ;;  %v320_v1 = vld [vmem:[%s2397_s2] sm:$0x3] }
  0x7c   : > { %422 = vmatprep.subr.bf16.mxu0 %v1459_v11  ;;  %1299 = vmatpush3.bf16.msra.mxu1 %v1475_v26  ;;  %v2015_v4 = vrot.slane %v320_v1, %v328_v2 }
  0x7d   : > { %1300 = vmatprep.subr.bf16.mxu1 %v1476_v27 }
  0x7f   : > { %423 = vmatpush1.bf16.msra.mxu0 %v1461_v12 }
  0x80   : > { %424 = vmatprep.subr.bf16.mxu0 %v1462_v14  ;;  %1301 = vmatpush3.bf16.msra.mxu1 %v1477_v29 }
  0x81   : > { %1302 = vmatprep.subr.bf16.mxu1 %v1478_v30 }
  0x83   : > { %425 = vmatpush1.bf16.msra.mxu0 %v1464_v19 }
  0x84   : > { %426 = vmatprep.subr.bf16.mxu0 %v1465_v20  ;;  %1303 = vmatpush3.bf16.msra.mxu1 %v1479_v57 }
  0x85   : > { %1304 = vmatprep.subr.bf16.mxu1 %v1480_v58 }
  0x87   : > { %427 = vmatpush1.bf16.msra.mxu0 %v1467_v22 }
  0x88   : > { %1305 = vmatpush3.bf16.msra.mxu1 %v1481_v59 }
  0x89   : > { %1306 = vmatprep.subr.bf16.mxu1 %v1482_v60 }
  0x8a   : > { %445 = vmatmul.mubr.bf16.vlgmr.msra.gmra.mrb[0].mxu0 %v294_v28 }
  0x8b   : > { %454 = vmatprep.mubr.bf16.mxu0 %v1687_v0 }
  0x8c   : > { %1307 = vmatpush3.bf16.msra.mxu1 %v1483_v61 }
  0x92   : > { %455 = vmatmul.mubr.bf16.gmra.mrb[4].mxu0 %v295_v33 }
  0x93   : > { %464 = vmatprep.mubr.bf16.mxu0 %v1687_v0 }
  0x9a   : > { %465 = vmatmul.mubr.bf16.gmra.mrb[8].mxu0 %v296_v36 }
  0x9b   : > { %474 = vmatprep.mubr.bf16.mxu0 %v1687_v0 }
  0xa2   : > { %475 = vmatmul.mubr.bf16.gmra.mrb[12].mxu0 %v297_v39 }
  0xa3   : > { %484 = vmatprep.mubr.bf16.mxu0 %v1687_v0 }
  0xaa   : > { %485 = vmatmul.mubr.bf16.gmra.mrb[16].mxu0 %v298_v42 }
  0xab   : > { %494 = vmatprep.mubr.bf16.mxu0 %v1687_v0 }
  0xb2   : > { %495 = vmatmul.mubr.bf16.gmra.mrb[20].mxu0 %v299_v45 }
  0xb3   : > { %504 = vmatprep.mubr.bf16.mxu0 %v1687_v0 }
  0xba   : > { %505 = vmatmul.mubr.bf16.gmra.mrb[24].mxu0 %v300_v48 }
  0xbb   : > { %514 = vmatprep.mubr.bf16.mxu0 %v1687_v0 }
  0xc2   : > { %515 = vmatmul.mubr.bf16.gmra.mrb[28].mxu0 %v301_v51 }
  0xc3   : > { %524 = vmatprep.mubr.bf16.mxu0 %v1687_v0 }
  0xca   : > { %525 = vmatmul.mubr.bf16.gmra.mrb[32].mxu0 %v302_v54 }
  0xcb   : > { %534 = vmatprep.mubr.bf16.mxu0 %v1687_v0  ;;  %v324_v0 = vsub.s32 0, %v2002_v63 }
  0xcd   : > { %v2011_v3 = vrot.slane %v320_v1, %v324_v0 }
  0xd2   : > { %535 = vmatmul.mubr.bf16.gmra.mrb[36].mxu0 %v303_v56 }
 0x15d   : > { %v446_v5 = vpop.f32.mrb[0].mxu0 }
 0x15e   : > { %v447_v6 = vadd.f32 %v446_v5, %v2011_v3  ;;  %v448_v7 = vpop.f32.mrb[1].mxu0 }
 0x15f   : > { %v449_v8 = vadd.f32 %v448_v7, %v2015_v4  ;;  %v450_v9 = vpop.f32.mrb[2].mxu0 }
 0x160   : > { %v451_v10 = vadd.f32 %v450_v9, %v2011_v3  ;;  %v452_v11 = vpop.f32.mrb[3].mxu0  ;;  %v543_v13 = vmax.f32 %v447_v6, 0.0 }
 0x161   : > { %v453_v12 = vadd.f32 %v452_v11, %v2015_v4  ;;  %v544_v15 = vmax.f32 %v449_v8, 0.0 }
 0x162   : > { %v545_v14 = vmax.f32 %v451_v10, 0.0 }
 0x163   : > { %v546_v16 = vmax.f32 %v453_v12, 0.0 }
 0x164   : > { %v581_v17 = vpack.c.bf16 %v545_v14, %v543_v13 }
 0x165   : > { %v456_v18 = vpop.f32.mrb[4].mxu0  ;;  %v582_v19 = vpack.c.bf16 %v546_v16, %v544_v15 }
 0x166   : > { %v457_v20 = vadd.f32 %v456_v18, %v2011_v3  ;;  %v458_v21 = vpop.f32.mrb[5].mxu0 }
 0x167   : > { %v459_v22 = vadd.f32 %v458_v21, %v2015_v4  ;;  %v460_v24 = vpop.f32.mrb[6].mxu0  ;;  %766 = vmatprep.mubr.bf16.mxu1 %v582_v19 }
 0x168   : > { %v461_v26 = vadd.f32 %v460_v24, %v2011_v3  ;;  %v462_v27 = vpop.f32.mrb[7].mxu0  ;;  %767 = vmatmul.mubr.bf16.vlgmr.msra.gmra.mrb[0].mxu1 %v581_v17  ;;  %v547_v29 = vmax.f32 %v457_v20, 0.0 }
 0x169   : > { %v463_v28 = vadd.f32 %v462_v27, %v2015_v4  ;;  %v548_v33 = vmax.f32 %v459_v22, 0.0 }
 0x16a   : > { %v549_v30 = vmax.f32 %v461_v26, 0.0 }
 0x16b   : > { %v550_v36 = vmax.f32 %v463_v28, 0.0 }
 0x16c   : > { %v583_v39 = vpack.c.bf16 %v549_v30, %v547_v29 }
 0x16d   : > { %v584_v42 = vpack.c.bf16 %v550_v36, %v548_v33  ;;  %v466_v45 = vpop.f32.mrb[8].mxu0 }
 0x16e   : > { %v467_v48 = vadd.f32 %v466_v45, %v2011_v3  ;;  %v468_v51 = vpop.f32.mrb[9].mxu0 }
 0x16f   : > { %v469_v54 = vadd.f32 %v468_v51, %v2015_v4  ;;  %v470_v56 = vpop.f32.mrb[10].mxu0  ;;  %774 = vmatprep.mubr.bf16.mxu1 %v584_v42 }
 0x170   : > { %v471_v57 = vadd.f32 %v470_v56, %v2011_v3  ;;  %v472_v58 = vpop.f32.mrb[11].mxu0  ;;  %775 = vmatmul.mubr.bf16.gmra.mrb[4].mxu1 %v583_v39  ;;  %v551_v60 = vmax.f32 %v467_v48, 0.0 }
 0x171   : > { %v473_v59 = vadd.f32 %v472_v58, %v2015_v4  ;;  %v552_v62 = vmax.f32 %v469_v54, 0.0 }
 0x172   : > { %v553_v61 = vmax.f32 %v471_v57, 0.0 }
 0x173   : > { %v554_v1 = vmax.f32 %v473_v59, 0.0 }
 0x174   : > { %v585_v5 = vpack.c.bf16 %v553_v61, %v551_v60 }
 0x175   : > { %v586_v6 = vpack.c.bf16 %v554_v1, %v552_v62  ;;  %v476_v7 = vpop.f32.mrb[12].mxu0 }
 0x176   : > { %v477_v8 = vadd.f32 %v476_v7, %v2011_v3  ;;  %v478_v9 = vpop.f32.mrb[13].mxu0 }
 0x177   : > { %v479_v10 = vadd.f32 %v478_v9, %v2015_v4  ;;  %v480_v11 = vpop.f32.mrb[14].mxu0  ;;  %782 = vmatprep.mubr.bf16.mxu1 %v586_v6 }
 0x178   : > { %v481_v12 = vadd.f32 %v480_v11, %v2011_v3  ;;  %v482_v13 = vpop.f32.mrb[15].mxu0  ;;  %783 = vmatmul.mubr.bf16.gmra.mrb[8].mxu1 %v585_v5  ;;  %v555_v15 = vmax.f32 %v477_v8, 0.0 }
 0x179   : > { %v483_v14 = vadd.f32 %v482_v13, %v2015_v4  ;;  %v556_v17 = vmax.f32 %v479_v10, 0.0 }
 0x17a   : > { %v557_v16 = vmax.f32 %v481_v12, 0.0 }
 0x17b   : > { %v558_v18 = vmax.f32 %v483_v14, 0.0 }
 0x17c   : > { %v587_v19 = vpack.c.bf16 %v557_v16, %v555_v15 }
 0x17d   : > { %v588_v20 = vpack.c.bf16 %v558_v18, %v556_v17  ;;  %v486_v21 = vpop.f32.mrb[16].mxu0 }
 0x17e   : > { %v487_v22 = vadd.f32 %v486_v21, %v2011_v3  ;;  %v488_v24 = vpop.f32.mrb[17].mxu0 }
 0x17f   : > { %v489_v26 = vadd.f32 %v488_v24, %v2015_v4  ;;  %v490_v27 = vpop.f32.mrb[18].mxu0  ;;  %790 = vmatprep.mubr.bf16.mxu1 %v588_v20 }
 0x180   : > { %v491_v28 = vadd.f32 %v490_v27, %v2011_v3  ;;  %v492_v29 = vpop.f32.mrb[19].mxu0  ;;  %791 = vmatmul.mubr.bf16.gmra.mrb[12].mxu1 %v587_v19  ;;  %v559_v33 = vmax.f32 %v487_v22, 0.0 }
 0x181   : > { %v493_v30 = vadd.f32 %v492_v29, %v2015_v4  ;;  %v560_v39 = vmax.f32 %v489_v26, 0.0 }
 0x182   : > { %v561_v36 = vmax.f32 %v491_v28, 0.0 }
 0x183   : > { %v562_v42 = vmax.f32 %v493_v30, 0.0 }
 0x184   : > { %v589_v45 = vpack.c.bf16 %v561_v36, %v559_v33 }
 0x185   : > { %v590_v48 = vpack.c.bf16 %v562_v42, %v560_v39  ;;  %v496_v51 = vpop.f32.mrb[20].mxu0 }
 0x186   : > { %v497_v54 = vadd.f32 %v496_v51, %v2011_v3  ;;  %v498_v56 = vpop.f32.mrb[21].mxu0 }
 0x187   : > { %v499_v57 = vadd.f32 %v498_v56, %v2015_v4  ;;  %v500_v58 = vpop.f32.mrb[22].mxu0  ;;  %798 = vmatprep.mubr.bf16.mxu1 %v590_v48 }
 0x188   : > { %v501_v59 = vadd.f32 %v500_v58, %v2011_v3  ;;  %v502_v60 = vpop.f32.mrb[23].mxu0  ;;  %799 = vmatmul.mubr.bf16.gmra.mrb[16].mxu1 %v589_v45  ;;  %v563_v62 = vmax.f32 %v497_v54, 0.0 }
 0x189   : > { %v503_v61 = vadd.f32 %v502_v60, %v2015_v4  ;;  %v564_v5 = vmax.f32 %v499_v57, 0.0 }
 0x18a   : > { %v565_v1 = vmax.f32 %v501_v59, 0.0 }
 0x18b   : > { %v566_v6 = vmax.f32 %v503_v61, 0.0 }
 0x18c   : > { %v591_v7 = vpack.c.bf16 %v565_v1, %v563_v62 }
 0x18d   : > { %v592_v8 = vpack.c.bf16 %v566_v6, %v564_v5  ;;  %v506_v9 = vpop.f32.mrb[24].mxu0 }
 0x18e   : > { %v507_v10 = vadd.f32 %v506_v9, %v2011_v3  ;;  %v508_v11 = vpop.f32.mrb[25].mxu0 }
 0x18f   : > { %v509_v12 = vadd.f32 %v508_v11, %v2015_v4  ;;  %v510_v13 = vpop.f32.mrb[26].mxu0  ;;  %806 = vmatprep.mubr.bf16.mxu1 %v592_v8 }
 0x190   : > { %v511_v14 = vadd.f32 %v510_v13, %v2011_v3  ;;  %v512_v15 = vpop.f32.mrb[27].mxu0  ;;  %807 = vmatmul.mubr.bf16.gmra.mrb[20].mxu1 %v591_v7  ;;  %v567_v17 = vmax.f32 %v507_v10, 0.0 }
 0x191   : > { %v513_v16 = vadd.f32 %v512_v15, %v2015_v4  ;;  %v568_v19 = vmax.f32 %v509_v12, 0.0 }
 0x192   : > { %v569_v18 = vmax.f32 %v511_v14, 0.0 }
 0x193   : > { %v570_v20 = vmax.f32 %v513_v16, 0.0 }
 0x194   : > { %v593_v21 = vpack.c.bf16 %v569_v18, %v567_v17 }
 0x195   : > { %v594_v22 = vpack.c.bf16 %v570_v20, %v568_v19  ;;  %v516_v24 = vpop.f32.mrb[28].mxu0 }
 0x196   : > { %v517_v26 = vadd.f32 %v516_v24, %v2011_v3  ;;  %v518_v27 = vpop.f32.mrb[29].mxu0 }
 0x197   : > { %v519_v28 = vadd.f32 %v518_v27, %v2015_v4  ;;  %v520_v29 = vpop.f32.mrb[30].mxu0  ;;  %814 = vmatprep.mubr.bf16.mxu1 %v594_v22 }
 0x198   : > { %v521_v30 = vadd.f32 %v520_v29, %v2011_v3  ;;  %v522_v33 = vpop.f32.mrb[31].mxu0  ;;  %815 = vmatmul.mubr.bf16.gmra.mrb[24].mxu1 %v593_v21  ;;  %v571_v39 = vmax.f32 %v517_v26, 0.0  ;;  %v2058_v21 = vld [vmem:[%s2399_s4] sm:$0x7] }
 0x199   : > { %v523_v36 = vadd.f32 %v522_v33, %v2015_v4  ;;  %v572_v45 = vmax.f32 %v519_v28, 0.0 }
 0x19a   : > { %v573_v42 = vmax.f32 %v521_v30, 0.0 }
 0x19b   : > { %v574_v48 = vmax.f32 %v523_v36, 0.0 }
 0x19c   : > { %v595_v51 = vpack.c.bf16 %v573_v42, %v571_v39 }
 0x19d   : > { %v596_v54 = vpack.c.bf16 %v574_v48, %v572_v45  ;;  %v526_v56 = vpop.f32.mrb[32].mxu0 }
 0x19e   : > { %v527_v57 = vadd.f32 %v526_v56, %v2011_v3  ;;  %v528_v58 = vpop.f32.mrb[33].mxu0 }
 0x19f   : > { %v529_v59 = vadd.f32 %v528_v58, %v2015_v4  ;;  %v530_v60 = vpop.f32.mrb[34].mxu0  ;;  %822 = vmatprep.mubr.bf16.mxu1 %v596_v54 }
 0x1a0   : > { %v531_v61 = vadd.f32 %v530_v60, %v2011_v3  ;;  %v532_v62 = vpop.f32.mrb[35].mxu0  ;;  %823 = vmatmul.mubr.bf16.gmra.mrb[28].mxu1 %v595_v51  ;;  %v575_v5 = vmax.f32 %v527_v57, 0.0 }
 0x1a1   : > { %v533_v1 = vadd.f32 %v532_v62, %v2015_v4  ;;  %v576_v7 = vmax.f32 %v529_v59, 0.0 }
 0x1a2   : > { %v577_v6 = vmax.f32 %v531_v61, 0.0 }
 0x1a3   : > { %v578_v8 = vmax.f32 %v533_v1, 0.0 }
 0x1a4   : > { %v597_v9 = vpack.c.bf16 %v577_v6, %v575_v5 }
 0x1a5   : > { %v598_v10 = vpack.c.bf16 %v578_v8, %v576_v7  ;;  %v536_v11 = vpop.f32.mrb[36].mxu0 }
 0x1a6   : > { %v537_v12 = vadd.f32 %v536_v11, %v2011_v3  ;;  %v538_v13 = vpop.f32.mrb[37].mxu0  ;;  %v2063_v3 = vrot.slane %v2058_v21, %v324_v0 }
 0x1a7   : > { %v539_v14 = vadd.f32 %v538_v13, %v2015_v4  ;;  %v540_v15 = vpop.f32.mrb[38].mxu0  ;;  %830 = vmatprep.mubr.bf16.mxu1 %v598_v10 }
 0x1a8   : > { %v541_v16 = vpop.f32.mrb[39].mxu0  ;;  %831 = vmatmul.mubr.bf16.gmra.mrb[32].mxu1 %v597_v9  ;;  %v579_v18 = vmax.f32 %v537_v12, 0.0 }
 0x1a9   : > { %v580_v17 = vmax.f32 %v539_v14, 0.0 }
 0x1aa   : > { %v599_v20 = vpack.c.bf16 %v579_v18, %v579_v18 }
 0x1ab   : > { %v600_v19 = vpack.c.bf16 %v580_v17, %v580_v17 }
 0x1ad   : > { %838 = vmatprep.mubr.bf16.mxu1 %v600_v19 }
 0x1b0   : > { %839 = vmatmul.mubr.bf16.gmra.mrb[36].mxu1 %v599_v20 }
 0x23b   : > { %v1308_v22 = vpop.f32.mrb[0].mxu1 }
 0x23c   : > { %v1309_v4 = vpop.f32.mrb[1].mxu1 }
 0x23d   : > { %v1310_v24 = vadd.f32 %v1309_v4, %v1308_v22  ;;  %v1311_v26 = vpop.f32.mrb[2].mxu1 }
 0x23e   : > { %v1312_v27 = vpop.f32.mrb[3].mxu1 }
 0x23f   : > { %v769_v28 = vadd.f32 %v1310_v24, %v2063_v3  ;;  %v1313_v29 = vadd.f32 %v1312_v27, %v1311_v26 }
 0x241   : > { %v772_v30 = vadd.f32 %v1313_v29, %v2063_v3  ;;  %v2068_v33 = vadd.f32 %v769_v28, %v1917_v23 }
 0x243   : > { %v1314_v36 = vpop.f32.mrb[4].mxu1  ;;  %865 = vadd.xlane.f32.xlu0 %v2068_v33  ;;  %v2072_v0 = vadd.f32 %v772_v30, %v1920_v25 }
 0x244   : > { %v1315_v39 = vpop.f32.mrb[5].mxu1 }
 0x245   : > { %v1316_v42 = vadd.f32 %v1315_v39, %v1314_v36  ;;  %v1317_v45 = vpop.f32.mrb[6].mxu1 }
 0x246   : > { %v1318_v48 = vpop.f32.mrb[7].mxu1 }
 0x247   : > { %v777_v51 = vadd.f32 %v1316_v42, %v2063_v3  ;;  %v1319_v54 = vadd.f32 %v1318_v48, %v1317_v45  ;;  %867 = vadd.xlane.f32.xlu0 %v2072_v0 }
 0x249   : > { %v780_v56 = vadd.f32 %v1319_v54, %v2063_v3  ;;  %v2078_v23 = vadd.f32 %v777_v51, %v1926_v31 }
 0x24b   : > { %v1320_v57 = vpop.f32.mrb[8].mxu1  ;;  %869 = vadd.xlane.f32.xlu1 %v2078_v23  ;;  %v2082_v25 = vadd.f32 %v780_v56, %v1929_v32 }
 0x24c   : > { %v1321_v58 = vpop.f32.mrb[9].mxu1 }
 0x24d   : > { %v1322_v59 = vadd.f32 %v1321_v58, %v1320_v57  ;;  %v1323_v60 = vpop.f32.mrb[10].mxu1 }
 0x24e   : > { %v1324_v61 = vpop.f32.mrb[11].mxu1 }
 0x24f   : > { %v785_v62 = vadd.f32 %v1322_v59, %v2063_v3  ;;  %v1325_v1 = vadd.f32 %v1324_v61, %v1323_v60  ;;  %871 = vadd.xlane.f32.xlu1 %v2082_v25 }
 0x251   : > { %v788_v5 = vadd.f32 %v1325_v1, %v2063_v3  ;;  %v2088_v31 = vadd.f32 %v785_v62, %v1935_v34 }
 0x253   : > { %v1326_v6 = vpop.f32.mrb[12].mxu1  ;;  %873 = vadd.xlane.f32.xlu0 %v2088_v31  ;;  %v2092_v7 = vadd.f32 %v788_v5, %v1938_v35 }
 0x254   : > { %v1327_v8 = vpop.f32.mrb[13].mxu1 }
 0x255   : > { %v1328_v32 = vadd.f32 %v1327_v8, %v1326_v6  ;;  %v1329_v9 = vpop.f32.mrb[14].mxu1  ;;  %875 = vadd.xlane.f32.xlu1 %v2092_v7 }
 0x256   : > { %v1330_v10 = vpop.f32.mrb[15].mxu1 }
 0x257   : > { %v793_v11 = vadd.f32 %v1328_v32, %v2063_v3  ;;  %v1331_v12 = vadd.f32 %v1330_v10, %v1329_v9 }
 0x259   : > { %v796_v13 = vadd.f32 %v1331_v12, %v2063_v3  ;;  %v2098_v34 = vadd.f32 %v793_v11, %v1944_v37 }
 0x25b   : > { %v1332_v14 = vpop.f32.mrb[16].mxu1  ;;  %877 = vadd.xlane.f32.xlu0 %v2098_v34  ;;  %v2102_v35 = vadd.f32 %v796_v13, %v1947_v38 }
 0x25c   : > { %v1333_v15 = vpop.f32.mrb[17].mxu1 }
 0x25d   : > { %v1334_v16 = vadd.f32 %v1333_v15, %v1332_v14  ;;  %v1335_v17 = vpop.f32.mrb[18].mxu1  ;;  %879 = vadd.xlane.f32.xlu1 %v2102_v35 }
 0x25e   : > { %v1336_v18 = vpop.f32.mrb[19].mxu1 }
 0x25f   : > { %v801_v19 = vadd.f32 %v1334_v16, %v2063_v3  ;;  %v1337_v20 = vadd.f32 %v1336_v18, %v1335_v17 }
 0x261   : > { %v804_v22 = vadd.f32 %v1337_v20, %v2063_v3  ;;  %v2108_v37 = vadd.f32 %v801_v19, %v1953_v40 }
 0x263   : > { %v1338_v4 = vpop.f32.mrb[20].mxu1  ;;  %881 = vadd.xlane.f32.xlu0 %v2108_v37  ;;  %v2112_v38 = vadd.f32 %v804_v22, %v1956_v41 }
 0x264   : > { %v1339_v24 = vpop.f32.mrb[21].mxu1 }
 0x265   : > { %v1340_v26 = vadd.f32 %v1339_v24, %v1338_v4  ;;  %v1341_v27 = vpop.f32.mrb[22].mxu1  ;;  %883 = vadd.xlane.f32.xlu1 %v2112_v38 }
 0x266   : > { %v1342_v28 = vpop.f32.mrb[23].mxu1 }
 0x267   : > { %v809_v29 = vadd.f32 %v1340_v26, %v2063_v3  ;;  %v1343_v30 = vadd.f32 %v1342_v28, %v1341_v27 }
 0x269   : > { %v812_v36 = vadd.f32 %v1343_v30, %v2063_v3  ;;  %v2118_v40 = vadd.f32 %v809_v29, %v1962_v43 }
 0x26b   : > { %v1344_v39 = vpop.f32.mrb[24].mxu1  ;;  %885 = vadd.xlane.f32.xlu0 %v2118_v40  ;;  %v2122_v41 = vadd.f32 %v812_v36, %v1965_v44 }
 0x26c   : > { %v1345_v42 = vpop.f32.mrb[25].mxu1 }
 0x26d   : > { %v1346_v45 = vadd.f32 %v1345_v42, %v1344_v39  ;;  %v1347_v48 = vpop.f32.mrb[26].mxu1  ;;  %887 = vadd.xlane.f32.xlu1 %v2122_v41 }
 0x26e   : > { %v1348_v51 = vpop.f32.mrb[27].mxu1 }
 0x26f   : > { %v817_v54 = vadd.f32 %v1346_v45, %v2063_v3  ;;  %v1349_v56 = vadd.f32 %v1348_v51, %v1347_v48 }
 0x271   : > { %v820_v57 = vadd.f32 %v1349_v56, %v2063_v3  ;;  %v2128_v43 = vadd.f32 %v817_v54, %v1971_v46 }
 0x273   : > { %v1350_v58 = vpop.f32.mrb[28].mxu1  ;;  %889 = vadd.xlane.f32.xlu0 %v2128_v43  ;;  %v2132_v44 = vadd.f32 %v820_v57, %v1974_v47 }
 0x274   : > { %v1351_v59 = vpop.f32.mrb[29].mxu1 }
 0x275   : > { %v1352_v60 = vadd.f32 %v1351_v59, %v1350_v58  ;;  %v1353_v61 = vpop.f32.mrb[30].mxu1  ;;  %891 = vadd.xlane.f32.xlu1 %v2132_v44 }
 0x276   : > { %v1354_v62 = vpop.f32.mrb[31].mxu1 }
 0x277   : > { %v825_v1 = vadd.f32 %v1352_v60, %v2063_v3  ;;  %v1355_v5 = vadd.f32 %v1354_v62, %v1353_v61 }
 0x279   : > { %v828_v6 = vadd.f32 %v1355_v5, %v2063_v3  ;;  %v2138_v46 = vadd.f32 %v825_v1, %v1980_v49 }
 0x27b   : > { %v1356_v8 = vpop.f32.mrb[32].mxu1  ;;  %893 = vadd.xlane.f32.xlu0 %v2138_v46  ;;  %v2142_v47 = vadd.f32 %v828_v6, %v1983_v50 }
 0x27c   : > { %v1357_v32 = vpop.f32.mrb[33].mxu1 }
 0x27d   : > { %v1358_v9 = vadd.f32 %v1357_v32, %v1356_v8  ;;  %v1359_v10 = vpop.f32.mrb[34].mxu1  ;;  %895 = vadd.xlane.f32.xlu1 %v2142_v47 }
 0x27e   : > { %v1360_v11 = vpop.f32.mrb[35].mxu1 }
 0x27f   : > { %v833_v12 = vadd.f32 %v1358_v9, %v2063_v3  ;;  %v1361_v13 = vadd.f32 %v1360_v11, %v1359_v10 }
 0x281   : > { %v836_v14 = vadd.f32 %v1361_v13, %v2063_v3  ;;  %v2148_v49 = vadd.f32 %v833_v12, %v1989_v52 }
 0x283   : > { %v1362_v15 = vpop.f32.mrb[36].mxu1  ;;  %897 = vadd.xlane.f32.xlu0 %v2148_v49  ;;  %v2152_v50 = vadd.f32 %v836_v14, %v1992_v53 }
 0x284   : > { %v1363_v16 = vpop.f32.mrb[37].mxu1 }
 0x285   : > { %v1364_v17 = vadd.f32 %v1363_v16, %v1362_v15  ;;  %v1365_v18 = vpop.f32.mrb[38].mxu1  ;;  %899 = vadd.xlane.f32.xlu1 %v2152_v50 }
 0x286   : > { %v1366_v19 = vpop.f32.mrb[39].mxu1 }
 0x287   : > { %v841_v20 = vadd.f32 %v1364_v17, %v2063_v3 }
 0x289   : > { %v2157_v22 = vadd.f32 %v841_v20, %v1998_v55 }
 0x28b   : > { %901 = vadd.xlane.f32.xlu0 %v2157_v22 }
 0x2d0   : > { %v866_v52 = vpop.xlane.xlu0 %865 }
 0x2d1   : > { %v904_v4 = vmul.f32 0.0078125, %v866_v52 }
 0x2d3   : > { %v2161_v24 = vsub.f32 %v2068_v33, %v904_v4 }
 0x2d4   : > { %v868_v53 = vpop.xlane.xlu0 %867 }
 0x2d5   : > { %v905_v26 = vmul.f32 0.0078125, %v868_v53  ;;  %v942_v27 = vmul.f32 %v2161_v24, %v2161_v24 }
 0x2d7   : > { %v2166_v28 = vsub.f32 %v2072_v0, %v905_v26  ;;  %961 = vadd.xlane.f32.xlu1 %v942_v27 }
 0x2d8   : > { %v870_v3 = vpop.xlane.xlu1 %869 }
 0x2d9   : > { %v906_v29 = vmul.f32 0.0078125, %v870_v3  ;;  %v943_v55 = vmul.f32 %v2166_v28, %v2166_v28 }
 0x2db   : > { %v2171_v30 = vsub.f32 %v2078_v23, %v906_v29  ;;  %963 = vadd.xlane.f32.xlu0 %v943_v55 }
 0x2dc   : > { %v872_v33 = vpop.xlane.xlu1 %871 }
 0x2dd   : > { %v907_v36 = vmul.f32 0.0078125, %v872_v33  ;;  %v944_v39 = vmul.f32 %v2171_v30, %v2171_v30 }
 0x2df   : > { %v2176_v42 = vsub.f32 %v2082_v25, %v907_v36  ;;  %965 = vadd.xlane.f32.xlu1 %v944_v39 }
 0x2e0   : > { %v874_v0 = vpop.xlane.xlu0 %873 }
 0x2e1   : > { %v908_v45 = vmul.f32 0.0078125, %v874_v0  ;;  %v945_v48 = vmul.f32 %v2176_v42, %v2176_v42 }
 0x2e2   : > { %v876_v51 = vpop.xlane.xlu1 %875 }
 0x2e3   : > { %v2181_v54 = vsub.f32 %v2088_v31, %v908_v45  ;;  %v909_v23 = vmul.f32 0.0078125, %v876_v51  ;;  %967 = vadd.xlane.f32.xlu0 %v945_v48 }
 0x2e5   : > { %v2184_v56 = vsub.f32 %v2092_v7, %v909_v23  ;;  %v946_v57 = vmul.f32 %v2181_v54, %v2181_v54 }
 0x2e7   : > { %969 = vadd.xlane.f32.xlu1 %v946_v57  ;;  %v947_v25 = vmul.f32 %v2184_v56, %v2184_v56 }
 0x2e8   : > { %v878_v58 = vpop.xlane.xlu0 %877 }
 0x2e9   : > { %v910_v59 = vmul.f32 0.0078125, %v878_v58  ;;  %971 = vadd.xlane.f32.xlu0 %v947_v25 }
 0x2ea   : > { %v880_v60 = vpop.xlane.xlu1 %879 }
 0x2eb   : > { %v2191_v61 = vsub.f32 %v2098_v34, %v910_v59  ;;  %v911_v31 = vmul.f32 0.0078125, %v880_v60 }
 0x2ed   : > { %v2194_v62 = vsub.f32 %v2102_v35, %v911_v31  ;;  %v948_v7 = vmul.f32 %v2191_v61, %v2191_v61 }
 0x2ef   : > { %973 = vadd.xlane.f32.xlu1 %v948_v7  ;;  %v949_v1 = vmul.f32 %v2194_v62, %v2194_v62 }
 0x2f0   : > { %v882_v5 = vpop.xlane.xlu0 %881 }
 0x2f1   : > { %v912_v6 = vmul.f32 0.0078125, %v882_v5  ;;  %975 = vadd.xlane.f32.xlu0 %v949_v1 }
 0x2f2   : > { %v884_v8 = vpop.xlane.xlu1 %883 }
 0x2f3   : > { %v2201_v32 = vsub.f32 %v2108_v37, %v912_v6  ;;  %v913_v34 = vmul.f32 0.0078125, %v884_v8  ;;  %v1100_v6 = vsub.s32 2, %v2002_v63 }
 0x2f5   : > { %v2204_v9 = vsub.f32 %v2112_v38, %v913_v34  ;;  %v950_v35 = vmul.f32 %v2201_v32, %v2201_v32  ;;  %v2259_v34 = vrot.slane %v2058_v21, %v328_v2 }
 0x2f7   : > { %977 = vadd.xlane.f32.xlu1 %v950_v35  ;;  %v951_v10 = vmul.f32 %v2204_v9, %v2204_v9 }
 0x2f8   : > { %v886_v11 = vpop.xlane.xlu0 %885 }
 0x2f9   : > { %v914_v12 = vmul.f32 0.0078125, %v886_v11  ;;  %979 = vadd.xlane.f32.xlu0 %v951_v10  ;;  %v2262_v11 = vrot.slane %v2058_v21, %v1100_v6 }
 0x2fa   : > { %v888_v13 = vpop.xlane.xlu1 %887 }
 0x2fb   : > { %v2211_v14 = vsub.f32 %v2118_v40, %v914_v12  ;;  %v915_v37 = vmul.f32 0.0078125, %v888_v13 }
 0x2fd   : > { %v2214_v15 = vsub.f32 %v2122_v41, %v915_v37  ;;  %v952_v38 = vmul.f32 %v2211_v14, %v2211_v14 }
 0x2ff   : > { %981 = vadd.xlane.f32.xlu1 %v952_v38  ;;  %v953_v16 = vmul.f32 %v2214_v15, %v2214_v15 }
 0x300   : > { %v890_v17 = vpop.xlane.xlu0 %889 }
 0x301   : > { %v916_v18 = vmul.f32 0.0078125, %v890_v17  ;;  %983 = vadd.xlane.f32.xlu0 %v953_v16 }
 0x302   : > { %v892_v19 = vpop.xlane.xlu1 %891 }
 0x303   : > { %v2221_v20 = vsub.f32 %v2128_v43, %v916_v18  ;;  %v917_v40 = vmul.f32 0.0078125, %v892_v19 }
 0x305   : > { %v2224_v52 = vsub.f32 %v2132_v44, %v917_v40  ;;  %v954_v41 = vmul.f32 %v2221_v20, %v2221_v20 }
 0x307   : > { %985 = vadd.xlane.f32.xlu1 %v954_v41  ;;  %v955_v4 = vmul.f32 %v2224_v52, %v2224_v52 }
 0x308   : > { %v894_v53 = vpop.xlane.xlu0 %893 }
 0x309   : > { %v918_v26 = vmul.f32 0.0078125, %v894_v53  ;;  %987 = vadd.xlane.f32.xlu0 %v955_v4 }
 0x30a   : > { %v896_v27 = vpop.xlane.xlu1 %895 }
 0x30b   : > { %v2231_v3 = vsub.f32 %v2138_v46, %v918_v26  ;;  %v919_v43 = vmul.f32 0.0078125, %v896_v27 }
 0x30d   : > { %v2234_v29 = vsub.f32 %v2142_v47, %v919_v43  ;;  %v956_v44 = vmul.f32 %v2231_v3, %v2231_v3 }
 0x30f   : > { %989 = vadd.xlane.f32.xlu1 %v956_v44  ;;  %v957_v55 = vmul.f32 %v2234_v29, %v2234_v29 }
 0x310   : > { %v898_v33 = vpop.xlane.xlu0 %897 }
 0x311   : > { %v920_v36 = vmul.f32 0.0078125, %v898_v33  ;;  %991 = vadd.xlane.f32.xlu0 %v957_v55 }
 0x312   : > { %v900_v39 = vpop.xlane.xlu1 %899 }
 0x313   : > { %v2241_v0 = vsub.f32 %v2148_v49, %v920_v36  ;;  %v921_v46 = vmul.f32 0.0078125, %v900_v39 }
 0x315   : > { %v2244_v45 = vsub.f32 %v2152_v50, %v921_v46  ;;  %v958_v47 = vmul.f32 %v2241_v0, %v2241_v0 }
 0x317   : > { %993 = vadd.xlane.f32.xlu1 %v958_v47  ;;  %v959_v48 = vmul.f32 %v2244_v45, %v2244_v45 }
 0x318   : > { %v902_v51 = vpop.xlane.xlu0 %901 }
 0x319   : > { %v922_v23 = vmul.f32 0.0078125, %v902_v51  ;;  %995 = vadd.xlane.f32.xlu0 %v959_v48 }
 0x31b   : > { %v2251_v57 = vsub.f32 %v2157_v22, %v922_v23 }
 0x31d   : > { %v960_v49 = vmul.f32 %v2251_v57, %v2251_v57 }
 0x31f   : > { %997 = vadd.xlane.f32.xlu1 %v960_v49 }
 0x364   : > { %v962_v25 = vpop.xlane.xlu1 %961 }
 0x365   : > { %v999_v50 = vmul.f32 0.0078125, %v962_v25 }
 0x367   : > { %v1018_v58 = vadd.f32 1e-05, %v999_v50 }
 0x368   : > { %v964_v59 = vpop.xlane.xlu0 %963 }
 0x369   : > { %1484 = vrsqrt.f32 %v1018_v58  ;;  %v1000_v60 = vmul.f32 0.0078125, %v964_v59 }
 0x36b   : > { %v1019_v31 = vadd.f32 1e-05, %v1000_v60 }
 0x36c   : > { %v966_v7 = vpop.xlane.xlu1 %965 }
 0x36d   : > { %1486 = vrsqrt.f32 %v1019_v31  ;;  %v1001_v1 = vmul.f32 0.0078125, %v966_v7 }
 0x36f   : > { %v1020_v5 = vadd.f32 1e-05, %v1001_v1 }
 0x370   : > { %v968_v8 = vpop.xlane.xlu0 %967 }
 0x371   : > { %1488 = vrsqrt.f32 %v1020_v5  ;;  %v1002_v22 = vmul.f32 0.0078125, %v968_v8 }
 0x373   : > { %v1485_v35 = vpop.eup %1484  ;;  %v1021_v10 = vadd.f32 1e-05, %v1002_v22 }
 0x374   : > { %v1056_v12 = vmul.f32 %v1485_v35, %v2161_v24  ;;  %v970_v13 = vpop.xlane.xlu1 %969 }
 0x375   : > { %1490 = vrsqrt.f32 %v1021_v10  ;;  %v1003_v37 = vmul.f32 0.0078125, %v970_v13 }
 0x376   : > { %v1079_v38 = vmul.f32 %v2259_v34, %v1056_v12  ;;  %v972_v16 = vpop.xlane.xlu0 %971 }
 0x377   : > { %v1487_v17 = vpop.eup %1486  ;;  %v1022_v18 = vadd.f32 1e-05, %v1003_v37  ;;  %v1004_v63 = vmul.f32 0.0078125, %v972_v16 }
 0x378   : > { %v1102_v2 = vadd.f32 %v2262_v11, %v1079_v38  ;;  %v1057_v19 = vmul.f32 %v1487_v17, %v2166_v28 }
 0x379   : > { %1492 = vrsqrt.f32 %v1022_v18  ;;  %v1023_v40 = vadd.f32 1e-05, %v1004_v63 }
 0x37a   : > { %1121 = vst [vmem:[%s2270_s14] sm:$0xff] %v1102_v2  ;;  %v1080_v21 = vmul.f32 %v2259_v34, %v1057_v19 }
 0x37b   : > { %v1489_v24 = vpop.eup %1488  ;;  %1494 = vrsqrt.f32 %v1023_v40 }
 0x37c   : > { %v1103_v41 = vadd.f32 %v2262_v11, %v1080_v21  ;;  %v1058_v4 = vmul.f32 %v1489_v24, %v2171_v30  ;;  %v974_v53 = vpop.xlane.xlu1 %973 }
 0x37d   : > { %v1005_v26 = vmul.f32 0.0078125, %v974_v53 }
 0x37e   : > { %1122 = vst [vmem:[%s2270_s14 + $0x8] sm:$0xff] %v1103_v41  ;;  %v1081_v28 = vmul.f32 %v2259_v34, %v1058_v4  ;;  %v976_v27 = vpop.xlane.xlu0 %975 }
 0x37f   : > { %v1491_v43 = vpop.eup %1490  ;;  %v1024_v44 = vadd.f32 1e-05, %v1005_v26  ;;  %v1006_v55 = vmul.f32 0.0078125, %v976_v27 }
 0x380   : > { %v1104_v33 = vadd.f32 %v2262_v11, %v1081_v28  ;;  %v1059_v36 = vmul.f32 %v1491_v43, %v2176_v42 }
 0x381   : > { %1496 = vrsqrt.f32 %v1024_v44  ;;  %v1025_v39 = vadd.f32 1e-05, %v1006_v55 }
 0x382   : > { %1123 = vst [vmem:[%s2270_s14 + $0x10] sm:$0xff] %v1104_v33  ;;  %v1082_v46 = vmul.f32 %v2259_v34, %v1059_v36 }
 0x383   : > { %v1493_v30 = vpop.eup %1492  ;;  %1498 = vrsqrt.f32 %v1025_v39 }
 0x384   : > { %v1105_v47 = vadd.f32 %v2262_v11, %v1082_v46  ;;  %v1060_v48 = vmul.f32 %v1493_v30, %v2181_v54  ;;  %v978_v51 = vpop.xlane.xlu1 %977 }
 0x385   : > { %v1495_v23 = vpop.eup %1494  ;;  %v1007_v49 = vmul.f32 0.0078125, %v978_v51 }
 0x386   : > { %1124 = vst [vmem:[%s2270_s14 + $0x18] sm:$0xff] %v1105_v47  ;;  %v1083_v25 = vmul.f32 %v2259_v34, %v1060_v48  ;;  %v1061_v42 = vmul.f32 %v1495_v23, %v2184_v56  ;;  %v980_v50 = vpop.xlane.xlu0 %979 }
 0x387   : > { %v1026_v58 = vadd.f32 1e-05, %v1007_v49  ;;  %v1008_v59 = vmul.f32 0.0078125, %v980_v50 }
 0x388   : > { %v1106_v60 = vadd.f32 %v2262_v11, %v1083_v25  ;;  %v1084_v31 = vmul.f32 %v2259_v34, %v1061_v42 }
 0x389   : > { %1500 = vrsqrt.f32 %v1026_v58  ;;  %v1027_v7 = vadd.f32 1e-05, %v1008_v59 }
 0x38a   : > { %1125 = vst [vmem:[%s2270_s14 + $0x20] sm:$0xff] %v1106_v60  ;;  %v1107_v54 = vadd.f32 %v2262_v11, %v1084_v31 }
 0x38b   : > { %v1497_v1 = vpop.eup %1496  ;;  %1502 = vrsqrt.f32 %v1027_v7 }
 0x38c   : > { %1126 = vst [vmem:[%s2270_s14 + $0x28] sm:$0xff] %v1107_v54  ;;  %v1062_v5 = vmul.f32 %v1497_v1, %v2191_v61  ;;  %v982_v6 = vpop.xlane.xlu1 %981 }
 0x38d   : > { %v1499_v56 = vpop.eup %1498  ;;  %v1009_v8 = vmul.f32 0.0078125, %v982_v6 }
 0x38e   : > { %v1085_v22 = vmul.f32 %v2259_v34, %v1062_v5  ;;  %v1063_v35 = vmul.f32 %v1499_v56, %v2194_v62  ;;  %v984_v10 = vpop.xlane.xlu0 %983 }
 0x38f   : > { %v1028_v12 = vadd.f32 1e-05, %v1009_v8  ;;  %v1010_v13 = vmul.f32 0.0078125, %v984_v10 }
 0x390   : > { %v1108_v37 = vadd.f32 %v2262_v11, %v1085_v22  ;;  %v1086_v38 = vmul.f32 %v2259_v34, %v1063_v35 }
 0x391   : > { %1504 = vrsqrt.f32 %v1028_v12  ;;  %v1029_v16 = vadd.f32 1e-05, %v1010_v13 }
 0x392   : > { %1127 = vst [vmem:[%s2270_s14 + $0x30] sm:$0xff] %v1108_v37  ;;  %v1109_v61 = vadd.f32 %v2262_v11, %v1086_v38 }
 0x393   : > { %v1501_v17 = vpop.eup %1500  ;;  %1506 = vrsqrt.f32 %v1029_v16 }
 0x394   : > { %1128 = vst [vmem:[%s2270_s14 + $0x38] sm:$0xff] %v1109_v61  ;;  %v1064_v18 = vmul.f32 %v1501_v17, %v2201_v32  ;;  %v986_v63 = vpop.xlane.xlu1 %985 }
 0x395   : > { %v1503_v62 = vpop.eup %1502  ;;  %v1011_v2 = vmul.f32 0.0078125, %v986_v63 }
 0x396   : > { %v1087_v19 = vmul.f32 %v2259_v34, %v1064_v18  ;;  %v1065_v40 = vmul.f32 %v1503_v62, %v2204_v9  ;;  %v988_v21 = vpop.xlane.xlu0 %987 }
 0x397   : > { %v1030_v24 = vadd.f32 1e-05, %v1011_v2  ;;  %v1012_v41 = vmul.f32 0.0078125, %v988_v21 }
 0x398   : > { %v1110_v4 = vadd.f32 %v2262_v11, %v1087_v19  ;;  %v1088_v53 = vmul.f32 %v2259_v34, %v1065_v40 }
 0x399   : > { %1508 = vrsqrt.f32 %v1030_v24  ;;  %v1031_v26 = vadd.f32 1e-05, %v1012_v41 }
 0x39a   : > { %1129 = vst [vmem:[%s2270_s14 + $0x40] sm:$0xff] %v1110_v4  ;;  %v1111_v32 = vadd.f32 %v2262_v11, %v1088_v53 }
 0x39b   : > { %v1505_v28 = vpop.eup %1504  ;;  %1510 = vrsqrt.f32 %v1031_v26 }
 0x39c   : > { %1130 = vst [vmem:[%s2270_s14 + $0x48] sm:$0xff] %v1111_v32  ;;  %v1066_v27 = vmul.f32 %v1505_v28, %v2211_v14  ;;  %v990_v43 = vpop.xlane.xlu1 %989 }
 0x39d   : > { %v1507_v9 = vpop.eup %1506  ;;  %v1013_v44 = vmul.f32 0.0078125, %v990_v43 }
 0x39e   : > { %v1089_v55 = vmul.f32 %v2259_v34, %v1066_v27  ;;  %v1067_v33 = vmul.f32 %v1507_v9, %v2214_v15  ;;  %v992_v36 = vpop.xlane.xlu0 %991 }
 0x39f   : > { %v1032_v39 = vadd.f32 1e-05, %v1013_v44  ;;  %v1014_v46 = vmul.f32 0.0078125, %v992_v36 }
 0x3a0   : > { %v1112_v30 = vadd.f32 %v2262_v11, %v1089_v55  ;;  %v1090_v47 = vmul.f32 %v2259_v34, %v1067_v33 }
 0x3a1   : > { %1512 = vrsqrt.f32 %v1032_v39  ;;  %v1033_v48 = vadd.f32 1e-05, %v1014_v46 }
 0x3a2   : > { %1131 = vst [vmem:[%s2270_s14 + $0x50] sm:$0xff] %v1112_v30  ;;  %v1113_v14 = vadd.f32 %v2262_v11, %v1090_v47 }
 0x3a3   : > { %v1509_v51 = vpop.eup %1508  ;;  %1514 = vrsqrt.f32 %v1033_v48 }
 0x3a4   : > { %1132 = vst [vmem:[%s2270_s14 + $0x58] sm:$0xff] %v1113_v14  ;;  %v1068_v23 = vmul.f32 %v1509_v51, %v2221_v20  ;;  %v994_v49 = vpop.xlane.xlu1 %993 }
 0x3a5   : > { %v1511_v15 = vpop.eup %1510  ;;  %v1015_v25 = vmul.f32 0.0078125, %v994_v49 }
 0x3a6   : > { %v1091_v42 = vmul.f32 %v2259_v34, %v1068_v23  ;;  %v1069_v50 = vmul.f32 %v1511_v15, %v2224_v52  ;;  %v996_v58 = vpop.xlane.xlu0 %995 }
 0x3a7   : > { %v1034_v59 = vadd.f32 1e-05, %v1015_v25  ;;  %v1016_v60 = vmul.f32 0.0078125, %v996_v58 }
 0x3a8   : > { %v1114_v31 = vadd.f32 %v2262_v11, %v1091_v42  ;;  %v1092_v7 = vmul.f32 %v2259_v34, %v1069_v50 }
 0x3a9   : > { %1516 = vrsqrt.f32 %v1034_v59  ;;  %v1035_v54 = vadd.f32 1e-05, %v1016_v60 }
 0x3aa   : > { %1133 = vst [vmem:[%s2270_s14 + $0x60] sm:$0xff] %v1114_v31  ;;  %v1115_v20 = vadd.f32 %v2262_v11, %v1092_v7 }
 0x3ab   : > { %v1513_v1 = vpop.eup %1512  ;;  %1518 = vrsqrt.f32 %v1035_v54 }
 0x3ac   : > { %1134 = vst [vmem:[%s2270_s14 + $0x68] sm:$0xff] %v1115_v20  ;;  %v1070_v5 = vmul.f32 %v1513_v1, %v2231_v3  ;;  %v998_v52 = vpop.xlane.xlu1 %997 }
 0x3ad   : > { %v1515_v6 = vpop.eup %1514  ;;  %v1017_v56 = vmul.f32 0.0078125, %v998_v52 }
 0x3ae   : > { %v1093_v8 = vmul.f32 %v2259_v34, %v1070_v5  ;;  %v1071_v22 = vmul.f32 %v1515_v6, %v2234_v29 }
 0x3af   : > { %v1036_v35 = vadd.f32 1e-05, %v1017_v56 }
 0x3b0   : > { %v1116_v10 = vadd.f32 %v2262_v11, %v1093_v8  ;;  %v1094_v12 = vmul.f32 %v2259_v34, %v1071_v22 }
 0x3b1   : > { %1520 = vrsqrt.f32 %v1036_v35 }
 0x3b2   : > { %1135 = vst [vmem:[%s2270_s14 + $0x70] sm:$0xff] %v1116_v10  ;;  %v1117_v3 = vadd.f32 %v2262_v11, %v1094_v12 }
 0x3b3   : > { %v1517_v13 = vpop.eup %1516 }
 0x3b4   : > { %1136 = vst [vmem:[%s2270_s14 + $0x78] sm:$0xff] %v1117_v3  ;;  %v1072_v37 = vmul.f32 %v1517_v13, %v2241_v0 }
 0x3b5   : > { %v1519_v38 = vpop.eup %1518 }
 0x3b6   : > { %v1095_v29 = vmul.f32 %v2259_v34, %v1072_v37  ;;  %v1073_v16 = vmul.f32 %v1519_v38, %v2244_v45 }
 0x3b8   : > { %v1118_v61 = vadd.f32 %v2262_v11, %v1095_v29  ;;  %v1096_v17 = vmul.f32 %v2259_v34, %v1073_v16 }
 0x3ba   : > { %1137 = vst [vmem:[%s2270_s14 + $0x80] sm:$0xff] %v1118_v61  ;;  %v1119_v18 = vadd.f32 %v2262_v11, %v1096_v17 }
 0x3bb   : > { %v1521_v63 = vpop.eup %1520 }
 0x3bc   : > { %1138 = vst [vmem:[%s2270_s14 + $0x88] sm:$0xff] %v1119_v18  ;;  %v1074_v0 = vmul.f32 %v1521_v63, %v2251_v57 }
 0x3be   : > { %v1097_v62 = vmul.f32 %v2259_v34, %v1074_v0 }
 0x3c0   : > { %v1120_v45 = vadd.f32 %v2262_v11, %v1097_v62 }
 0x3c2   : > { %1139 = vst [vmem:[%s2270_s14 + $0x90] sm:$0xff] %v1120_v45 }
 0x3c3   : > { %1621 = shalt.err (!%p1618_p1)
}
 0x3c4   : > { %s1622_s10 = scalar_lea.hbm %s2347_s13, 2432  ;;  %s1626_s16 = scalar_lea.hbm %s2400_s5, 4864 }
 0x3c5   : > { %p1623_p13 = scmp.ne.s32.totalorder %s2347_s13, %s1622_s10  ;;  %p1627_p4 = scmp.lt.u32.totalorder %s2347_s13, %s2400_s5 }
 0x3c6   : > { %p1628_p7 = scmp.lt.u32.totalorder %s1626_s16, %s1622_s10  ;;  %p1630_p11 = scmp.lt.u32.totalorder %s1622_s10, %s2347_s13 }
 0x3c7   : > { %p1624_p6 = pnand %p1623_p13, %p2416_p0 }
 0x3c8   : > { %p1629_p8 = por %p1628_p7, %p1627_p4 }
 0x3c9   : > { %p1625_p10 = pneg %p1624_p6 }
 0x3ca   : > { %p1631_p2 = por %p1630_p11, %p1629_p8 }
 0x3cc   : > { %p1632_p3 = pnand %p1631_p2, %p1625_p10 }
 0x3ce   : > { %1635 = shalt.err (!%p1632_p3)
}
 0x3cf   : > { %s1689_s17 = smov 128   ;;  %s1690_s29 = smov 8  }
 0x3d0   : > { %1380 = dma.vmem_to_hbm [thread:$0]  (%p2416_p0), %s2349_s28, 2432, %s2347_s13, %s1141_s22, %s1689_s17, %s1689_s17, %s1690_s29  }
 0x3d1 PF: > { %s1169_s9 = sand.u32 1, %s1666_s18   ;;  %p2417_p5 = scmp.ne.s32.totalorder %s2406_s25, 0 }
 0x3d2   : > { %p2418_p9 = scmp.ge.s32.totalorder %s1678_s21, 2  ;;  %s1170_s15 = scalar_lea.sflag [#allocation4], %s1169_s9 }
 0x3d4   : > { %p1394_p12 = pnand %p2418_p9, %p2417_p5 }
 0x3d6   : > { %1661 = dma.done.wait (!%p1394_p12), %s1170_s15, 2432  }
 0x3d7   : > { %1663 = vsyncadd (!%p1394_p12), %s1170_s15, 4294964864  ;;  %p19_p1 = scmp.ge.s32.totalorder %s1834_s23, 4   ;;  %s2419_s18 = smov %s1670_s19 }
 0x3d8   : > { %s2420_s19 = smov %s1674_s20  ;;  %s2421_s20 = smov %s1843_s7 }
 0x3d9   : > { %s2422_s21 = smov %s1834_s23  ;;  %21 = sbr.rel (!%p19_p1) target bundleno = 6 (0x6), region = 93 }
 0x3e0   :  { %1175 = vsyncpa [#allocation3], 1 }
 0x3e1   :  { %1177 = vsyncpa [#allocation3 + $0x1], 1 }
 0x3e2   :  { %1178 = vsyncpa [#allocation6], 1 }
 0x3e3   :  { %1179 = vsyncpa [#allocation4], 1 }
 0x3e4   :  { %1181 = vsyncpa [#allocation4 + $0x1], 1 }

// kernel: tpu_custom_call.1
= control target key start
LH: loop header
LB: loop body
LE: loop exit
PB: predicated region body
PF: predicated region fallthrough
CT: control target
= control target key end

     0   :  { %10 = vsyncpa [#allocation3], 0  ;;  %s2395_s0 = inlined_call_operand.hbm [shape: f32[304,128], index: 0, kind: input, shape index: {}]   ;;  %s2396_s1 = inlined_call_operand.hbm [shape: bf16[128,256], index: 1, kind: input, shape index: {}]   ;;  %s2397_s2 = inlined_call_operand.vmem [shape: f32[1,256], index: 2, kind: input, shape index: {}]   ;;  %s2398_s3 = inlined_call_operand.hbm [shape: bf16[256,128], index: 3, kind: input, shape index: {}]   ;;  %s2399_s4 = inlined_call_operand.vmem [shape: f32[3,128], index: 4, kind: input, shape index: {}]   ;;  %s2400_s5 = inlined_call_operand.hbm [shape: f32[304,128], index: 5, kind: output, shape index: {}]  }
   0x1   :  { %12 = vsyncpa [#allocation3 + $0x1], 0 }
   0x2   :  { %13 = vsyncpa [#allocation6], 0 }
   0x3   :  { %14 = vsyncpa [#allocation4], 0 }
   0x4   :  { %16 = vsyncpa [#allocation4 + $0x1], 0  ;;  %s1721_s18 = smov 0   ;;  %s1723_s19 = smov 0  }
   0x5   :  { %s1725_s20 = smov 0   ;;  %s1727_s21 = smov 0  }
   0x6 LB: > { %s1742_s22 = sadd.s32 4294967295, %s1678_s21   ;;  %s1246_s23 = sadd.s32 4294967294, %s1678_s21   ;;  %s1678_s21 = sphi %s1727_s21, %s2422_s21   ;;  %s1674_s20 = sphi %s1725_s20, %s2421_s20   ;;  %s1670_s19 = sphi %s1723_s19, %s2420_s19   ;;  %s1666_s18 = sphi %s1721_s18, %s2419_s18  }
   0x7   : > { %p42_p0 = scmp.ne.s32.totalorder %s1670_s19, %s1666_s18  ;;  %p2401_p1 = scmp.eq.s32.totalorder %s1742_s22, 0 }
   0x8   : > { %p156_p3 = scmp.eq.s32.totalorder %s1246_s23, 1  ;;  %p1247_p5 = scmp.ge.s32.totalorder %s1678_s21, 1 }
   0x9   : > { %p1751_p4 = por %p2401_p1, %p42_p0  ;;  %p163_p7 = scmp.lt.s32.totalorder %s1678_s21, 3 }
   0xa   : > { %p1756_p6 = por %p156_p3, %p42_p0  ;;  %s1680_s27 = smov [#allocation5]  }
   0xb   : > { %s2405_s24 = scalar_select %p1751_p4, 1, 0 }
   0xc   : > { %s2406_s25 = scalar_select %p1756_p6, 1, 0 }
   0xd   : > { %p1761_p8 = pnand %p1247_p5, %p163_p7  ;;  %s175_s28 = sshll.u32 %s1680_s27, 4  ;;  %s1765_s28 = int_to_ptr.vmem [resolvable:$true] %s175_s28 }
   0xe   : > { %s1681_s30 = smov [#allocation7]   ;;  %s1522_s9 = scalar_lea.hbm %s2396_s1, 2048 }
   0xf   : > { %p1382_p9 = pneg %p1761_p8  ;;  %s191_s6 = sshll.u32 %s1681_s30, 4  ;;  %s1776_s6 = int_to_ptr.vmem [resolvable:$true] %s191_s6 }
  0x10   : > { %p1523_p12 = scmp.ne.s32.totalorder %s2396_s1, %s1522_s9  ;;  %p1529_p5 = scmp.lt.u32.totalorder %s1522_s9, %s2396_s1 }
  0x11   : > { %p1772_p11 = pnand %p1382_p9, %p2401_p1 }
  0x13   : > { %p1524_p13 = pneg %p1772_p11 }
  0x15   : > { %p1525_p0 = pnand %p1524_p13, %p1523_p12 }
  0x17   : > { %p1526_p3 = pneg %p1525_p0 }
  0x19   : > { %p1531_p7 = pnand %p1529_p5, %p1526_p3 }
  0x1b   : > { %1534 = shalt.err (!%p1531_p7)
}
  0x1c   : > { %s1535_s14 = scalar_lea.vmem %s1765_s28, 2048  ;;  %p1543_p2 = scmp.lt.s32.totalorder %s1765_s28, %s1765_s28 }
  0x1d   : > { %p1536_p9 = scmp.ne.s32.totalorder %s1765_s28, %s1535_s14  ;;  %p1544_p12 = scmp.lt.s32.totalorder %s1535_s14, %s1535_s14 }
  0x1f   : > { %p1538_p10 = pnand %p1536_p9, %p1524_p13  ;;  %p1545_p0 = por %p1544_p12, %p1543_p2 }
  0x21   : > { %p1539_p1 = pneg %p1538_p10 }
  0x23   : > { %p1546_p6 = pnand %p1545_p0, %p1539_p1 }
  0x25   : > { %1549 = shalt.err (!%p1546_p6)
}
  0x26   : > { %s2402_s15 = smov 128   ;;  %s1683_s16 = smov 8  }
  0x27   : > { %1385 = dma.hbm_to_vmem [thread:$0]  (!%p1772_p11), %s2396_s1, 2048, %s1765_s28, [#allocation6], %s2402_s15, %s2402_s15, %s1683_s16  }
  0x28   : > { %s1550_s7 = scalar_lea.hbm %s2398_s3, 2048 }
  0x29   : > { %p1551_p1 = scmp.ne.s32.totalorder %s2398_s3, %s1550_s7  ;;  %p1557_p10 = scmp.lt.u32.totalorder %s1550_s7, %s2398_s3 }
  0x2b   : > { %p1553_p2 = pnand %p1551_p1, %p1524_p13 }
  0x2d   : > { %p1554_p6 = pneg %p1553_p2 }
  0x2f   : > { %p1559_p3 = pnand %p1557_p10, %p1554_p6 }
  0x31   : > { %1562 = shalt.err (!%p1559_p3)
}
  0x32   : > { %s1563_s28 = scalar_lea.vmem %s1776_s6, 2048  ;;  %p1571_p12 = scmp.lt.s32.totalorder %s1776_s6, %s1776_s6 }
  0x33   : > { %p1564_p5 = scmp.ne.s32.totalorder %s1776_s6, %s1563_s28  ;;  %p1572_p0 = scmp.lt.s32.totalorder %s1563_s28, %s1563_s28 }
  0x35   : > { %p1566_p7 = pnand %p1564_p5, %p1524_p13  ;;  %p1573_p1 = por %p1572_p0, %p1571_p12 }
  0x37   : > { %p1567_p9 = pneg %p1566_p7 }
  0x39   : > { %p1574_p2 = pnand %p1573_p1, %p1567_p9 }
  0x3b   : > { %1577 = shalt.err (!%p1574_p2)
}
  0x3c   : > { %s1684_s12 = smov 64   ;;  %s1685_s13 = smov 4  }
  0x3d   : > { %1388 = dma.hbm_to_vmem [thread:$0]  (!%p1772_p11), %s2398_s3, 2048, %s1776_s6, [#allocation6], %s1684_s12, %s1684_s12, %s1685_s13  }
  0x3e   : > { %s1834_s23 = sadd.s32 1, %s1678_s21   ;;  %s29_s30 = sadd.s32 1, %s1674_s20 }
  0x3f   : > { %s26_s27 = ssub.s32 %s1678_s21, %s1834_s23  ;;  %p36_p6 = scmp.ne.s32.totalorder %s1674_s20, %s1670_s19 }
  0x40   : > { %p27_p13 = scmp.eq.s32.totalorder %s26_s27, 0  ;;  %p37_p10 = scmp.eq.s32.totalorder %s1678_s21, 0 }
  0x41   : > { %p2409_p5 = scmp.eq.s32.totalorder %s1742_s22, 1  ;;  %p1399_p9 = scmp.lt.s32.totalorder %s1678_s21, 2 }
  0x42   : > { %s1843_s7 = scalar_select %p27_p13, %s1674_s20, %s29_s30  }
  0x43   : > { %p38_p3 = por %p37_p10, %p36_p6  ;;  %p1847_p7 = por %p2409_p5, %p36_p6 }
  0x44   : > { %s208_s29 = sand.u32 1, %s1674_s20   ;;  %s1290_s6 = smul.u32 2432, %s1678_s21 }
  0x45   : > { %s2410_s8 = scalar_select %p1847_p7, 1, 0 }
  0x46   : > { %s1368_s9 = smul.u32 152, %s208_s29  ;;  %p1854_p11 = pnand %p1399_p9, %p38_p3 }
  0x47   : > { %s1861_s12 = scalar_lea.hbm %s2395_s0, %s1290_s6  ;;  %s1865_s17 = scalar_lea.sflag [#allocation3], %s208_s29 }
  0x48   : > { %s212_s13 = scalar_lea.vmem [#allocation2], %s1368_s9  ;;  %s1578_s27 = scalar_lea.hbm %s1861_s12, 2432 }
  0x49   : > { %s219_s14 = sshll.u32 %s212_s13, 4  ;;  %p1579_p12 = scmp.ne.s32.totalorder %s1861_s12, %s1578_s27  ;;  %s1863_s14 = int_to_ptr.vmem [resolvable:$true] %s219_s14 }
  0x4a   : > { %p1580_p0 = pneg %p1854_p11  ;;  %s1583_s11 = scalar_lea.hbm %s2395_s0, 4864 }
  0x4b   : > { %p1584_p13 = scmp.lt.u32.totalorder %s1861_s12, %s2395_s0  ;;  %p1585_p6 = scmp.lt.u32.totalorder %s1583_s11, %s1578_s27 }
  0x4c   : > { %p1581_p1 = pnand %p1580_p0, %p1579_p12  ;;  %p1587_p3 = scmp.lt.u32.totalorder %s1578_s27, %s1861_s12 }
  0x4d   : > { %p1586_p10 = por %p1585_p6, %p1584_p13 }
  0x4e   : > { %p1582_p2 = pneg %p1581_p1 }
  0x4f   : > { %p1588_p5 = por %p1587_p3, %p1586_p10 }
  0x51   : > { %p1589_p9 = pnand %p1588_p5, %p1582_p2 }
  0x53   : > { %1592 = shalt.err (!%p1589_p9)
}
  0x54   : > { %s1593_s29 = scalar_lea.vmem %s1863_s14, 2432  ;;  %s1686_s9 = smov [#allocation2]  }
  0x55   : > { %p1594_p12 = scmp.ne.s32.totalorder %s1863_s14, %s1593_s29  ;;  %s1598_s13 = sshll.u32 %s1686_s9, 4  ;;  %s1599_s13 = int_to_ptr.vmem [resolvable:$false] %s1598_s13 }
  0x56   : > { %s1600_s15 = scalar_lea.vmem %s1599_s13, 4864  ;;  %p1601_p4 = scmp.lt.s32.totalorder %s1863_s14, %s1599_s13 }
  0x57   : > { %p1596_p1 = pnand %p1594_p12, %p1580_p0  ;;  %p1602_p13 = scmp.lt.s32.totalorder %s1600_s15, %s1593_s29 }
  0x59   : > { %p1597_p7 = pneg %p1596_p1  ;;  %p1603_p6 = por %p1602_p13, %p1601_p4 }
  0x5b   : > { %p1604_p10 = pnand %p1603_p6, %p1597_p7 }
  0x5d   : > { %1607 = shalt.err (!%p1604_p10)
}
  0x5e   : > { %s2412_s27 = smov 128   ;;  %231 = sbr.rel (%p1761_p8) target bundleno = 977 (0x3d1), region = 40 }
  0x5f   : > { %1392 = dma.hbm_to_vmem [thread:$0]  (!%p1854_p11), %s1861_s12, 2432, %s1863_s14, %s1865_s17, %s2412_s27, %s2412_s27, %s1683_s16  }
  0x60   : > { %s1899_s30 = sand.u32 (!%p1761_p8), 1, %s1670_s19   ;;  %p2413_p4 = scmp.ne.s32.totalorder (!%p1761_p8), %s2405_s24, 0 }
  0x61   : > { %s1369_s6 = smul.u32 (!%p1761_p8), 152, %s1899_s30  ;;  %s234_s11 = scalar_lea.sflag (!%p1761_p8), [#allocation3], %s1899_s30 }
  0x63   : > { %s1905_s10 = scalar_lea.vmem (!%p1761_p8), [#allocation2], %s1369_s6 }
  0x65   : > { %1653 = dma.done.wait (%p2413_p4), %s234_s11, 2432  }
  0x66   : > { %1655 = vsyncadd (%p2413_p4), %s234_s11, 4294964864  ;;  %p2414_p7 = scmp.eq.s32.totalorder %s1742_s22, 0 }
  0x68   : > { %1657 = dma.done.wait (%p2414_p7), [#allocation6], 4096   ;;  %p2415_p8 = pmov %p2414_p7 }
  0x69   : > { %v1687_v0 = vmov 0   ;;  %v1444_v1 = vld [vmem:[#allocation5 + $0x4] ss:$8 sps:$4 sm:$0xff]   ;;  %v1446_v2 = vld [vmem:[#allocation5] ss:$8 sps:$4 sm:$0xff]   ;;  %v1472_v18 = vld [vmem:[#allocation7 + $0x50] sm:$0xff]   ;;  %v322_v62 = vlaneseq }
  0x6a   : > { %1659 = vsyncadd (%p2415_p8), [#allocation6], 4294963200  ;;  %444 = vmatprep.mubr.bf16.mxu0 %v1687_v0  ;;  %412 = vmatprep.subr.bf16.mxu0 %v1444_v1  ;;  %v1447_v3 = vld [vmem:[#allocation5 + $0x14] ss:$8 sps:$4 sm:$0xff]   ;;  %v1449_v4 = vld [vmem:[#allocation5 + $0x10] ss:$8 sps:$4 sm:$0xff]  }
  0x6b   : > { %413 = vmatpush1.bf16.msra.mxu0 %v1446_v2  ;;  %v1450_v5 = vld [vmem:[#allocation5 + $0x24] ss:$8 sps:$4 sm:$0xff]   ;;  %v1452_v6 = vld [vmem:[#allocation5 + $0x20] ss:$8 sps:$4 sm:$0xff]   ;;  %v1453_v7 = vld [vmem:[#allocation5 + $0x34] ss:$8 sps:$4 sm:$0xff]  }
  0x6c   : > { %414 = vmatprep.subr.bf16.mxu0 %v1447_v3  ;;  %v1455_v8 = vld [vmem:[#allocation5 + $0x30] ss:$8 sps:$4 sm:$0xff]   ;;  %v1456_v9 = vld [vmem:[#allocation5 + $0x44] ss:$8 sps:$4 sm:$0xff]   ;;  %v1458_v10 = vld [vmem:[#allocation5 + $0x40] ss:$8 sps:$4 sm:$0xff]  }
  0x6d   : > { %v1459_v11 = vld [vmem:[#allocation5 + $0x54] ss:$8 sps:$4 sm:$0xff]   ;;  %v1461_v12 = vld [vmem:[#allocation5 + $0x50] ss:$8 sps:$4 sm:$0xff]   ;;  %v1468_v13 = vld [vmem:[#allocation7 + $0x40] sm:$0xff]   ;;  %v2002_v63 = vshrl.u32 %v322_v62, 7 }
  0x6e   : > { %v1462_v14 = vld [vmem:[#allocation5 + $0x64] ss:$8 sps:$4 sm:$0xff]   ;;  %1292 = vmatprep.subr.bf16.mxu1 %v1468_v13  ;;  %v1464_v19 = vld [vmem:[#allocation5 + $0x60] ss:$8 sps:$4 sm:$0xff]   ;;  %v1465_v20 = vld [vmem:[#allocation5 + $0x74] ss:$8 sps:$4 sm:$0xff]  }
  0x6f   : > { %415 = vmatpush1.bf16.msra.mxu0 %v1449_v4  ;;  %v1469_v15 = vld [vmem:[#allocation7] sm:$0xff]   ;;  %v1470_v16 = vld [vmem:[#allocation7 + $0x48] sm:$0xff]   ;;  %v1473_v21 = vld [vmem:[#allocation7 + $0x10] sm:$0xff]   ;;  %v328_v2 = vsub.s32 1, %v2002_v63  ;;  %s2270_s14 = scalar_lea.vmem [#allocation8], %s1369_s6  ;;  %s1291_s17 = smul.u32 2432, %s1742_s22 }
  0x70   : > { %416 = vmatprep.subr.bf16.mxu0 %v1450_v5  ;;  %1293 = vmatpush3.bf16.msra.mxu1 %v1469_v15  ;;  %v1471_v17 = vld [vmem:[#allocation7 + $0x8] sm:$0xff]   ;;  %v1467_v22 = vld [vmem:[#allocation5 + $0x70] ss:$8 sps:$4 sm:$0xff]   ;;  %v1476_v27 = vld [vmem:[#allocation7 + $0x60] sm:$0xff]   ;;  %s1154_s28 = sshll.u32 %s2270_s14, 4  ;;  %s1141_s22 = scalar_lea.sflag [#allocation4], %s1899_s30  ;;  %s2349_s28 = int_to_ptr.vmem [resolvable:$true] %s1154_s28 }
  0x71   : > { %1294 = vmatprep.subr.bf16.mxu1 %v1470_v16  ;;  %v1917_v23 = vld [vmem:[%s1905_s10] sm:$0xff]  ;;  %v1474_v24 = vld [vmem:[#allocation7 + $0x58] sm:$0xff]   ;;  %v1477_v29 = vld [vmem:[#allocation7 + $0x20] sm:$0xff]   ;;  %s2347_s13 = scalar_lea.hbm %s2400_s5, %s1291_s17  ;;  %s1608_s15 = scalar_lea.vmem %s2349_s28, 2432 }
  0x72   : > { %v1920_v25 = vld [vmem:[%s1905_s10 + $0x8] sm:$0xff]  ;;  %v1478_v30 = vld [vmem:[#allocation7 + $0x68] sm:$0xff]   ;;  %v1926_v31 = vld [vmem:[%s1905_s10 + $0x10] sm:$0xff]  ;;  %p1609_p11 = scmp.ne.s32.totalorder %s2349_s28, %s1608_s15  ;;  %p2416_p0 = scmp.ne.s32.totalorder %s2410_s8, 0 }
  0x73   : > { %417 = vmatpush1.bf16.msra.mxu0 %v1452_v6  ;;  %v1475_v26 = vld [vmem:[#allocation7 + $0x18] sm:$0xff]   ;;  %v294_v28 = vpack.c.bf16 %v1920_v25, %v1917_v23  ;;  %v1929_v32 = vld [vmem:[%s1905_s10 + $0x18] sm:$0xff]  ;;  %v1935_v34 = vld [vmem:[%s1905_s10 + $0x20] sm:$0xff]  ;;  %s1688_s27 = smov [#allocation8]  }
  0x74   : > { %418 = vmatprep.subr.bf16.mxu0 %v1453_v7  ;;  %1295 = vmatpush3.bf16.msra.mxu1 %v1471_v17  ;;  %v295_v33 = vpack.c.bf16 %v1929_v32, %v1926_v31  ;;  %v1938_v35 = vld [vmem:[%s1905_s10 + $0x28] sm:$0xff]  ;;  %v1944_v37 = vld [vmem:[%s1905_s10 + $0x30] sm:$0xff]  ;;  %v1947_v38 = vld [vmem:[%s1905_s10 + $0x38] sm:$0xff]  ;;  %p1610_p2 = pnand %p1609_p11, %p2416_p0  ;;  %s1612_s6 = sshll.u32 %s1688_s27, 4  ;;  %s1613_s6 = int_to_ptr.vmem [resolvable:$false] %s1612_s6 }
  0x75   : > { %1296 = vmatprep.subr.bf16.mxu1 %v1472_v18  ;;  %v296_v36 = vpack.c.bf16 %v1938_v35, %v1935_v34  ;;  %v297_v39 = vpack.c.bf16 %v1947_v38, %v1944_v37  ;;  %v1953_v40 = vld [vmem:[%s1905_s10 + $0x40] sm:$0xff]  ;;  %v1956_v41 = vld [vmem:[%s1905_s10 + $0x48] sm:$0xff]  ;;  %v1962_v43 = vld [vmem:[%s1905_s10 + $0x50] sm:$0xff]  ;;  %s1614_s11 = scalar_lea.vmem %s1613_s6, 4864  ;;  %p1615_p5 = scmp.lt.s32.totalorder %s2349_s28, %s1613_s6 }
  0x76   : > { %v298_v42 = vpack.c.bf16 %v1956_v41, %v1953_v40  ;;  %v1965_v44 = vld [vmem:[%s1905_s10 + $0x58] sm:$0xff]  ;;  %v1971_v46 = vld [vmem:[%s1905_s10 + $0x60] sm:$0xff]  ;;  %v1974_v47 = vld [vmem:[%s1905_s10 + $0x68] sm:$0xff]  ;;  %p1611_p3 = pneg %p1610_p2  ;;  %p1616_p9 = scmp.lt.s32.totalorder %s1614_s11, %s1608_s15 }
  0x77   : > { %419 = vmatpush1.bf16.msra.mxu0 %v1455_v8  ;;  %v299_v45 = vpack.c.bf16 %v1965_v44, %v1962_v43  ;;  %v300_v48 = vpack.c.bf16 %v1974_v47, %v1971_v46  ;;  %v1980_v49 = vld [vmem:[%s1905_s10 + $0x70] sm:$0xff]  ;;  %v1983_v50 = vld [vmem:[%s1905_s10 + $0x78] sm:$0xff]  ;;  %v1989_v52 = vld [vmem:[%s1905_s10 + $0x80] sm:$0xff] }
  0x78   : > { %420 = vmatprep.subr.bf16.mxu0 %v1456_v9  ;;  %1297 = vmatpush3.bf16.msra.mxu1 %v1473_v21  ;;  %v301_v51 = vpack.c.bf16 %v1983_v50, %v1980_v49  ;;  %v1992_v53 = vld [vmem:[%s1905_s10 + $0x88] sm:$0xff]  ;;  %v1998_v55 = vld [vmem:[%s1905_s10 + $0x90] sm:$0xff]  ;;  %v1479_v57 = vld [vmem:[#allocation7 + $0x28] sm:$0xff]   ;;  %p1617_p12 = por %p1616_p9, %p1615_p5 }
  0x79   : > { %1298 = vmatprep.subr.bf16.mxu1 %v1474_v24  ;;  %v302_v54 = vpack.c.bf16 %v1992_v53, %v1989_v52  ;;  %v303_v56 = vpack.c.bf16 %v1998_v55, %v1998_v55  ;;  %v1480_v58 = vld [vmem:[#allocation7 + $0x70] sm:$0xff]   ;;  %v1482_v60 = vld [vmem:[#allocation7 + $0x78] sm:$0xff]  }
  0x7a   : > { %v1481_v59 = vld [vmem:[#allocation7 + $0x30] sm:$0xff]   ;;  %v1483_v61 = vld [vmem:[#allocation7 + $0x38] sm:$0xff]   ;;  %p1618_p1 = pnand %p1617_p12, %p1611_p3 }
  0x7b   : > { %421 = vmatpush1.bf16.msra.mxu0 %v1458_v10  ;;  %v320_v1 = vld [vmem:[%s2397_s2] sm:$0x3] }
  0x7c   : > { %422 = vmatprep.subr.bf16.mxu0 %v1459_v11  ;;  %1299 = vmatpush3.bf16.msra.mxu1 %v1475_v26  ;;  %v2015_v4 = vrot.slane %v320_v1, %v328_v2 }
  0x7d   : > { %1300 = vmatprep.subr.bf16.mxu1 %v1476_v27 }
  0x7f   : > { %423 = vmatpush1.bf16.msra.mxu0 %v1461_v12 }
  0x80   : > { %424 = vmatprep.subr.bf16.mxu0 %v1462_v14  ;;  %1301 = vmatpush3.bf16.msra.mxu1 %v1477_v29 }
  0x81   : > { %1302 = vmatprep.subr.bf16.mxu1 %v1478_v30 }
  0x83   : > { %425 = vmatpush1.bf16.msra.mxu0 %v1464_v19 }
  0x84   : > { %426 = vmatprep.subr.bf16.mxu0 %v1465_v20  ;;  %1303 = vmatpush3.bf16.msra.mxu1 %v1479_v57 }
  0x85   : > { %1304 = vmatprep.subr.bf16.mxu1 %v1480_v58 }
  0x87   : > { %427 = vmatpush1.bf16.msra.mxu0 %v1467_v22 }
  0x88   : > { %1305 = vmatpush3.bf16.msra.mxu1 %v1481_v59 }
  0x89   : > { %1306 = vmatprep.subr.bf16.mxu1 %v1482_v60 }
  0x8a   : > { %445 = vmatmul.mubr.bf16.vlgmr.msra.gmra.mrb[0].mxu0 %v294_v28 }
  0x8b   : > { %454 = vmatprep.mubr.bf16.mxu0 %v1687_v0 }
  0x8c   : > { %1307 = vmatpush3.bf16.msra.mxu1 %v1483_v61 }
  0x92   : > { %455 = vmatmul.mubr.bf16.gmra.mrb[4].mxu0 %v295_v33 }
  0x93   : > { %464 = vmatprep.mubr.bf16.mxu0 %v1687_v0 }
  0x9a   : > { %465 = vmatmul.mubr.bf16.gmra.mrb[8].mxu0 %v296_v36 }
  0x9b   : > { %474 = vmatprep.mubr.bf16.mxu0 %v1687_v0 }
  0xa2   : > { %475 = vmatmul.mubr.bf16.gmra.mrb[12].mxu0 %v297_v39 }
  0xa3   : > { %484 = vmatprep.mubr.bf16.mxu0 %v1687_v0 }
  0xaa   : > { %485 = vmatmul.mubr.bf16.gmra.mrb[16].mxu0 %v298_v42 }
  0xab   : > { %494 = vmatprep.mubr.bf16.mxu0 %v1687_v0 }
  0xb2   : > { %495 = vmatmul.mubr.bf16.gmra.mrb[20].mxu0 %v299_v45 }
  0xb3   : > { %504 = vmatprep.mubr.bf16.mxu0 %v1687_v0 }
  0xba   : > { %505 = vmatmul.mubr.bf16.gmra.mrb[24].mxu0 %v300_v48 }
  0xbb   : > { %514 = vmatprep.mubr.bf16.mxu0 %v1687_v0 }
  0xc2   : > { %515 = vmatmul.mubr.bf16.gmra.mrb[28].mxu0 %v301_v51 }
  0xc3   : > { %524 = vmatprep.mubr.bf16.mxu0 %v1687_v0 }
  0xca   : > { %525 = vmatmul.mubr.bf16.gmra.mrb[32].mxu0 %v302_v54 }
  0xcb   : > { %534 = vmatprep.mubr.bf16.mxu0 %v1687_v0  ;;  %v324_v0 = vsub.s32 0, %v2002_v63 }
  0xcd   : > { %v2011_v3 = vrot.slane %v320_v1, %v324_v0 }
  0xd2   : > { %535 = vmatmul.mubr.bf16.gmra.mrb[36].mxu0 %v303_v56 }
 0x15d   : > { %v446_v5 = vpop.f32.mrb[0].mxu0 }
 0x15e   : > { %v447_v6 = vadd.f32 %v446_v5, %v2011_v3  ;;  %v448_v7 = vpop.f32.mrb[1].mxu0 }
 0x15f   : > { %v449_v8 = vadd.f32 %v448_v7, %v2015_v4  ;;  %v450_v9 = vpop.f32.mrb[2].mxu0 }
 0x160   : > { %v451_v10 = vadd.f32 %v450_v9, %v2011_v3  ;;  %v452_v11 = vpop.f32.mrb[3].mxu0  ;;  %v543_v13 = vmax.f32 %v447_v6, 0.0 }
 0x161   : > { %v453_v12 = vadd.f32 %v452_v11, %v2015_v4  ;;  %v544_v15 = vmax.f32 %v449_v8, 0.0 }
 0x162   : > { %v545_v14 = vmax.f32 %v451_v10, 0.0 }
 0x163   : > { %v546_v16 = vmax.f32 %v453_v12, 0.0 }
 0x164   : > { %v581_v17 = vpack.c.bf16 %v545_v14, %v543_v13 }
 0x165   : > { %v456_v18 = vpop.f32.mrb[4].mxu0  ;;  %v582_v19 = vpack.c.bf16 %v546_v16, %v544_v15 }
 0x166   : > { %v457_v20 = vadd.f32 %v456_v18, %v2011_v3  ;;  %v458_v21 = vpop.f32.mrb[5].mxu0 }
 0x167   : > { %v459_v22 = vadd.f32 %v458_v21, %v2015_v4  ;;  %v460_v24 = vpop.f32.mrb[6].mxu0  ;;  %766 = vmatprep.mubr.bf16.mxu1 %v582_v19 }
 0x168   : > { %v461_v26 = vadd.f32 %v460_v24, %v2011_v3  ;;  %v462_v27 = vpop.f32.mrb[7].mxu0  ;;  %767 = vmatmul.mubr.bf16.vlgmr.msra.gmra.mrb[0].mxu1 %v581_v17  ;;  %v547_v29 = vmax.f32 %v457_v20, 0.0 }
 0x169   : > { %v463_v28 = vadd.f32 %v462_v27, %v2015_v4  ;;  %v548_v33 = vmax.f32 %v459_v22, 0.0 }
 0x16a   : > { %v549_v30 = vmax.f32 %v461_v26, 0.0 }
 0x16b   : > { %v550_v36 = vmax.f32 %v463_v28, 0.0 }
 0x16c   : > { %v583_v39 = vpack.c.bf16 %v549_v30, %v547_v29 }
 0x16d   : > { %v584_v42 = vpack.c.bf16 %v550_v36, %v548_v33  ;;  %v466_v45 = vpop.f32.mrb[8].mxu0 }
 0x16e   : > { %v467_v48 = vadd.f32 %v466_v45, %v2011_v3  ;;  %v468_v51 = vpop.f32.mrb[9].mxu0 }
 0x16f   : > { %v469_v54 = vadd.f32 %v468_v51, %v2015_v4  ;;  %v470_v56 = vpop.f32.mrb[10].mxu0  ;;  %774 = vmatprep.mubr.bf16.mxu1 %v584_v42 }
 0x170   : > { %v471_v57 = vadd.f32 %v470_v56, %v2011_v3  ;;  %v472_v58 = vpop.f32.mrb[11].mxu0  ;;  %775 = vmatmul.mubr.bf16.gmra.mrb[4].mxu1 %v583_v39  ;;  %v551_v60 = vmax.f32 %v467_v48, 0.0 }
 0x171   : > { %v473_v59 = vadd.f32 %v472_v58, %v2015_v4  ;;  %v552_v62 = vmax.f32 %v469_v54, 0.0 }
 0x172   : > { %v553_v61 = vmax.f32 %v471_v57, 0.0 }
 0x173   : > { %v554_v1 = vmax.f32 %v473_v59, 0.0 }
 0x174   : > { %v585_v5 = vpack.c.bf16 %v553_v61, %v551_v60 }
 0x175   : > { %v586_v6 = vpack.c.bf16 %v554_v1, %v552_v62  ;;  %v476_v7 = vpop.f32.mrb[12].mxu0 }
 0x176   : > { %v477_v8 = vadd.f32 %v476_v7, %v2011_v3  ;;  %v478_v9 = vpop.f32.mrb[13].mxu0 }
 0x177   : > { %v479_v10 = vadd.f32 %v478_v9, %v2015_v4  ;;  %v480_v11 = vpop.f32.mrb[14].mxu0  ;;  %782 = vmatprep.mubr.bf16.mxu1 %v586_v6 }
 0x178   : > { %v481_v12 = vadd.f32 %v480_v11, %v2011_v3  ;;  %v482_v13 = vpop.f32.mrb[15].mxu0  ;;  %783 = vmatmul.mubr.bf16.gmra.mrb[8].mxu1 %v585_v5  ;;  %v555_v15 = vmax.f32 %v477_v8, 0.0 }
 0x179   : > { %v483_v14 = vadd.f32 %v482_v13, %v2015_v4  ;;  %v556_v17 = vmax.f32 %v479_v10, 0.0 }
 0x17a   : > { %v557_v16 = vmax.f32 %v481_v12, 0.0 }
 0x17b   : > { %v558_v18 = vmax.f32 %v483_v14, 0.0 }
 0x17c   : > { %v587_v19 = vpack.c.bf16 %v557_v16, %v555_v15 }
 0x17d   : > { %v588_v20 = vpack.c.bf16 %v558_v18, %v556_v17  ;;  %v486_v21 = vpop.f32.mrb[16].mxu0 }
 0x17e   : > { %v487_v22 = vadd.f32 %v486_v21, %v2011_v3  ;;  %v488_v24 = vpop.f32.mrb[17].mxu0 }
 0x17f   : > { %v489_v26 = vadd.f32 %v488_v24, %v2015_v4  ;;  %v490_v27 = vpop.f32.mrb[18].mxu0  ;;  %790 = vmatprep.mubr.bf16.mxu1 %v588_v20 }
 0x180   : > { %v491_v28 = vadd.f32 %v490_v27, %v2011_v3  ;;  %v492_v29 = vpop.f32.mrb[19].mxu0  ;;  %791 = vmatmul.mubr.bf16.gmra.mrb[12].mxu1 %v587_v19  ;;  %v559_v33 = vmax.f32 %v487_v22, 0.0 }
 0x181   : > { %v493_v30 = vadd.f32 %v492_v29, %v2015_v4  ;;  %v560_v39 = vmax.f32 %v489_v26, 0.0 }
 0x182   : > { %v561_v36 = vmax.f32 %v491_v28, 0.0 }
 0x183   : > { %v562_v42 = vmax.f32 %v493_v30, 0.0 }
 0x184   : > { %v589_v45 = vpack.c.bf16 %v561_v36, %v559_v33 }
 0x185   : > { %v590_v48 = vpack.c.bf16 %v562_v42, %v560_v39  ;;  %v496_v51 = vpop.f32.mrb[20].mxu0 }
 0x186   : > { %v497_v54 = vadd.f32 %v496_v51, %v2011_v3  ;;  %v498_v56 = vpop.f32.mrb[21].mxu0 }
 0x187   : > { %v499_v57 = vadd.f32 %v498_v56, %v2015_v4  ;;  %v500_v58 = vpop.f32.mrb[22].mxu0  ;;  %798 = vmatprep.mubr.bf16.mxu1 %v590_v48 }
 0x188   : > { %v501_v59 = vadd.f32 %v500_v58, %v2011_v3  ;;  %v502_v60 = vpop.f32.mrb[23].mxu0  ;;  %799 = vmatmul.mubr.bf16.gmra.mrb[16].mxu1 %v589_v45  ;;  %v563_v62 = vmax.f32 %v497_v54, 0.0 }
 0x189   : > { %v503_v61 = vadd.f32 %v502_v60, %v2015_v4  ;;  %v564_v5 = vmax.f32 %v499_v57, 0.0 }
 0x18a   : > { %v565_v1 = vmax.f32 %v501_v59, 0.0 }
 0x18b   : > { %v566_v6 = vmax.f32 %v503_v61, 0.0 }
 0x18c   : > { %v591_v7 = vpack.c.bf16 %v565_v1, %v563_v62 }
 0x18d   : > { %v592_v8 = vpack.c.bf16 %v566_v6, %v564_v5  ;;  %v506_v9 = vpop.f32.mrb[24].mxu0 }
 0x18e   : > { %v507_v10 = vadd.f32 %v506_v9, %v2011_v3  ;;  %v508_v11 = vpop.f32.mrb[25].mxu0 }
 0x18f   : > { %v509_v12 = vadd.f32 %v508_v11, %v2015_v4  ;;  %v510_v13 = vpop.f32.mrb[26].mxu0  ;;  %806 = vmatprep.mubr.bf16.mxu1 %v592_v8 }
 0x190   : > { %v511_v14 = vadd.f32 %v510_v13, %v2011_v3  ;;  %v512_v15 = vpop.f32.mrb[27].mxu0  ;;  %807 = vmatmul.mubr.bf16.gmra.mrb[20].mxu1 %v591_v7  ;;  %v567_v17 = vmax.f32 %v507_v10, 0.0 }
 0x191   : > { %v513_v16 = vadd.f32 %v512_v15, %v2015_v4  ;;  %v568_v19 = vmax.f32 %v509_v12, 0.0 }
 0x192   : > { %v569_v18 = vmax.f32 %v511_v14, 0.0 }
 0x193   : > { %v570_v20 = vmax.f32 %v513_v16, 0.0 }
 0x194   : > { %v593_v21 = vpack.c.bf16 %v569_v18, %v567_v17 }
 0x195   : > { %v594_v22 = vpack.c.bf16 %v570_v20, %v568_v19  ;;  %v516_v24 = vpop.f32.mrb[28].mxu0 }
 0x196   : > { %v517_v26 = vadd.f32 %v516_v24, %v2011_v3  ;;  %v518_v27 = vpop.f32.mrb[29].mxu0 }
 0x197   : > { %v519_v28 = vadd.f32 %v518_v27, %v2015_v4  ;;  %v520_v29 = vpop.f32.mrb[30].mxu0  ;;  %814 = vmatprep.mubr.bf16.mxu1 %v594_v22 }
 0x198   : > { %v521_v30 = vadd.f32 %v520_v29, %v2011_v3  ;;  %v522_v33 = vpop.f32.mrb[31].mxu0  ;;  %815 = vmatmul.mubr.bf16.gmra.mrb[24].mxu1 %v593_v21  ;;  %v571_v39 = vmax.f32 %v517_v26, 0.0  ;;  %v2058_v21 = vld [vmem:[%s2399_s4] sm:$0x7] }
 0x199   : > { %v523_v36 = vadd.f32 %v522_v33, %v2015_v4  ;;  %v572_v45 = vmax.f32 %v519_v28, 0.0 }
 0x19a   : > { %v573_v42 = vmax.f32 %v521_v30, 0.0 }
 0x19b   : > { %v574_v48 = vmax.f32 %v523_v36, 0.0 }
 0x19c   : > { %v595_v51 = vpack.c.bf16 %v573_v42, %v571_v39 }
 0x19d   : > { %v596_v54 = vpack.c.bf16 %v574_v48, %v572_v45  ;;  %v526_v56 = vpop.f32.mrb[32].mxu0 }
 0x19e   : > { %v527_v57 = vadd.f32 %v526_v56, %v2011_v3  ;;  %v528_v58 = vpop.f32.mrb[33].mxu0 }
 0x19f   : > { %v529_v59 = vadd.f32 %v528_v58, %v2015_v4  ;;  %v530_v60 = vpop.f32.mrb[34].mxu0  ;;  %822 = vmatprep.mubr.bf16.mxu1 %v596_v54 }
 0x1a0   : > { %v531_v61 = vadd.f32 %v530_v60, %v2011_v3  ;;  %v532_v62 = vpop.f32.mrb[35].mxu0  ;;  %823 = vmatmul.mubr.bf16.gmra.mrb[28].mxu1 %v595_v51  ;;  %v575_v5 = vmax.f32 %v527_v57, 0.0 }
 0x1a1   : > { %v533_v1 = vadd.f32 %v532_v62, %v2015_v4  ;;  %v576_v7 = vmax.f32 %v529_v59, 0.0 }
 0x1a2   : > { %v577_v6 = vmax.f32 %v531_v61, 0.0 }
 0x1a3   : > { %v578_v8 = vmax.f32 %v533_v1, 0.0 }
 0x1a4   : > { %v597_v9 = vpack.c.bf16 %v577_v6, %v575_v5 }
 0x1a5   : > { %v598_v10 = vpack.c.bf16 %v578_v8, %v576_v7  ;;  %v536_v11 = vpop.f32.mrb[36].mxu0 }
 0x1a6   : > { %v537_v12 = vadd.f32 %v536_v11, %v2011_v3  ;;  %v538_v13 = vpop.f32.mrb[37].mxu0  ;;  %v2063_v3 = vrot.slane %v2058_v21, %v324_v0 }
 0x1a7   : > { %v539_v14 = vadd.f32 %v538_v13, %v2015_v4  ;;  %v540_v15 = vpop.f32.mrb[38].mxu0  ;;  %830 = vmatprep.mubr.bf16.mxu1 %v598_v10 }
 0x1a8   : > { %v541_v16 = vpop.f32.mrb[39].mxu0  ;;  %831 = vmatmul.mubr.bf16.gmra.mrb[32].mxu1 %v597_v9  ;;  %v579_v18 = vmax.f32 %v537_v12, 0.0 }
 0x1a9   : > { %v580_v17 = vmax.f32 %v539_v14, 0.0 }
 0x1aa   : > { %v599_v20 = vpack.c.bf16 %v579_v18, %v579_v18 }
 0x1ab   : > { %v600_v19 = vpack.c.bf16 %v580_v17, %v580_v17 }
 0x1ad   : > { %838 = vmatprep.mubr.bf16.mxu1 %v600_v19 }
 0x1b0   : > { %839 = vmatmul.mubr.bf16.gmra.mrb[36].mxu1 %v599_v20 }
 0x23b   : > { %v1308_v22 = vpop.f32.mrb[0].mxu1 }
 0x23c   : > { %v1309_v4 = vpop.f32.mrb[1].mxu1 }
 0x23d   : > { %v1310_v24 = vadd.f32 %v1309_v4, %v1308_v22  ;;  %v1311_v26 = vpop.f32.mrb[2].mxu1 }
 0x23e   : > { %v1312_v27 = vpop.f32.mrb[3].mxu1 }
 0x23f   : > { %v769_v28 = vadd.f32 %v1310_v24, %v2063_v3  ;;  %v1313_v29 = vadd.f32 %v1312_v27, %v1311_v26 }
 0x241   : > { %v772_v30 = vadd.f32 %v1313_v29, %v2063_v3  ;;  %v2068_v33 = vadd.f32 %v769_v28, %v1917_v23 }
 0x243   : > { %v1314_v36 = vpop.f32.mrb[4].mxu1  ;;  %865 = vadd.xlane.f32.xlu0 %v2068_v33  ;;  %v2072_v0 = vadd.f32 %v772_v30, %v1920_v25 }
 0x244   : > { %v1315_v39 = vpop.f32.mrb[5].mxu1 }
 0x245   : > { %v1316_v42 = vadd.f32 %v1315_v39, %v1314_v36  ;;  %v1317_v45 = vpop.f32.mrb[6].mxu1 }
 0x246   : > { %v1318_v48 = vpop.f32.mrb[7].mxu1 }
 0x247   : > { %v777_v51 = vadd.f32 %v1316_v42, %v2063_v3  ;;  %v1319_v54 = vadd.f32 %v1318_v48, %v1317_v45  ;;  %867 = vadd.xlane.f32.xlu0 %v2072_v0 }
 0x249   : > { %v780_v56 = vadd.f32 %v1319_v54, %v2063_v3  ;;  %v2078_v23 = vadd.f32 %v777_v51, %v1926_v31 }
 0x24b   : > { %v1320_v57 = vpop.f32.mrb[8].mxu1  ;;  %869 = vadd.xlane.f32.xlu1 %v2078_v23  ;;  %v2082_v25 = vadd.f32 %v780_v56, %v1929_v32 }
 0x24c   : > { %v1321_v58 = vpop.f32.mrb[9].mxu1 }
 0x24d   : > { %v1322_v59 = vadd.f32 %v1321_v58, %v1320_v57  ;;  %v1323_v60 = vpop.f32.mrb[10].mxu1 }
 0x24e   : > { %v1324_v61 = vpop.f32.mrb[11].mxu1 }
 0x24f   : > { %v785_v62 = vadd.f32 %v1322_v59, %v2063_v3  ;;  %v1325_v1 = vadd.f32 %v1324_v61, %v1323_v60  ;;  %871 = vadd.xlane.f32.xlu1 %v2082_v25 }
 0x251   : > { %v788_v5 = vadd.f32 %v1325_v1, %v2063_v3  ;;  %v2088_v31 = vadd.f32 %v785_v62, %v1935_v34 }
 0x253   : > { %v1326_v6 = vpop.f32.mrb[12].mxu1  ;;  %873 = vadd.xlane.f32.xlu0 %v2088_v31  ;;  %v2092_v7 = vadd.f32 %v788_v5, %v1938_v35 }
 0x254   : > { %v1327_v8 = vpop.f32.mrb[13].mxu1 }
 0x255   : > { %v1328_v32 = vadd.f32 %v1327_v8, %v1326_v6  ;;  %v1329_v9 = vpop.f32.mrb[14].mxu1  ;;  %875 = vadd.xlane.f32.xlu1 %v2092_v7 }
 0x256   : > { %v1330_v10 = vpop.f32.mrb[15].mxu1 }
 0x257   : > { %v793_v11 = vadd.f32 %v1328_v32, %v2063_v3  ;;  %v1331_v12 = vadd.f32 %v1330_v10, %v1329_v9 }
 0x259   : > { %v796_v13 = vadd.f32 %v1331_v12, %v2063_v3  ;;  %v2098_v34 = vadd.f32 %v793_v11, %v1944_v37 }
 0x25b   : > { %v1332_v14 = vpop.f32.mrb[16].mxu1  ;;  %877 = vadd.xlane.f32.xlu0 %v2098_v34  ;;  %v2102_v35 = vadd.f32 %v796_v13, %v1947_v38 }
 0x25c   : > { %v1333_v15 = vpop.f32.mrb[17].mxu1 }
 0x25d   : > { %v1334_v16 = vadd.f32 %v1333_v15, %v1332_v14  ;;  %v1335_v17 = vpop.f32.mrb[18].mxu1  ;;  %879 = vadd.xlane.f32.xlu1 %v2102_v35 }
 0x25e   : > { %v1336_v18 = vpop.f32.mrb[19].mxu1 }
 0x25f   : > { %v801_v19 = vadd.f32 %v1334_v16, %v2063_v3  ;;  %v1337_v20 = vadd.f32 %v1336_v18, %v1335_v17 }
 0x261   : > { %v804_v22 = vadd.f32 %v1337_v20, %v2063_v3  ;;  %v2108_v37 = vadd.f32 %v801_v19, %v1953_v40 }
 0x263   : > { %v1338_v4 = vpop.f32.mrb[20].mxu1  ;;  %881 = vadd.xlane.f32.xlu0 %v2108_v37  ;;  %v2112_v38 = vadd.f32 %v804_v22, %v1956_v41 }
 0x264   : > { %v1339_v24 = vpop.f32.mrb[21].mxu1 }
 0x265   : > { %v1340_v26 = vadd.f32 %v1339_v24, %v1338_v4  ;;  %v1341_v27 = vpop.f32.mrb[22].mxu1  ;;  %883 = vadd.xlane.f32.xlu1 %v2112_v38 }
 0x266   : > { %v1342_v28 = vpop.f32.mrb[23].mxu1 }
 0x267   : > { %v809_v29 = vadd.f32 %v1340_v26, %v2063_v3  ;;  %v1343_v30 = vadd.f32 %v1342_v28, %v1341_v27 }
 0x269   : > { %v812_v36 = vadd.f32 %v1343_v30, %v2063_v3  ;;  %v2118_v40 = vadd.f32 %v809_v29, %v1962_v43 }
 0x26b   : > { %v1344_v39 = vpop.f32.mrb[24].mxu1  ;;  %885 = vadd.xlane.f32.xlu0 %v2118_v40  ;;  %v2122_v41 = vadd.f32 %v812_v36, %v1965_v44 }
 0x26c   : > { %v1345_v42 = vpop.f32.mrb[25].mxu1 }
 0x26d   : > { %v1346_v45 = vadd.f32 %v1345_v42, %v1344_v39  ;;  %v1347_v48 = vpop.f32.mrb[26].mxu1  ;;  %887 = vadd.xlane.f32.xlu1 %v2122_v41 }
 0x26e   : > { %v1348_v51 = vpop.f32.mrb[27].mxu1 }
 0x26f   : > { %v817_v54 = vadd.f32 %v1346_v45, %v2063_v3  ;;  %v1349_v56 = vadd.f32 %v1348_v51, %v1347_v48 }
 0x271   : > { %v820_v57 = vadd.f32 %v1349_v56, %v2063_v3  ;;  %v2128_v43 = vadd.f32 %v817_v54, %v1971_v46 }
 0x273   : > { %v1350_v58 = vpop.f32.mrb[28].mxu1  ;;  %889 = vadd.xlane.f32.xlu0 %v2128_v43  ;;  %v2132_v44 = vadd.f32 %v820_v57, %v1974_v47 }
 0x274   : > { %v1351_v59 = vpop.f32.mrb[29].mxu1 }
 0x275   : > { %v1352_v60 = vadd.f32 %v1351_v59, %v1350_v58  ;;  %v1353_v61 = vpop.f32.mrb[30].mxu1  ;;  %891 = vadd.xlane.f32.xlu1 %v2132_v44 }
 0x276   : > { %v1354_v62 = vpop.f32.mrb[31].mxu1 }
 0x277   : > { %v825_v1 = vadd.f32 %v1352_v60, %v2063_v3  ;;  %v1355_v5 = vadd.f32 %v1354_v62, %v1353_v61 }
 0x279   : > { %v828_v6 = vadd.f32 %v1355_v5, %v2063_v3  ;;  %v2138_v46 = vadd.f32 %v825_v1, %v1980_v49 }
 0x27b   : > { %v1356_v8 = vpop.f32.mrb[32].mxu1  ;;  %893 = vadd.xlane.f32.xlu0 %v2138_v46  ;;  %v2142_v47 = vadd.f32 %v828_v6, %v1983_v50 }
 0x27c   : > { %v1357_v32 = vpop.f32.mrb[33].mxu1 }
 0x27d   : > { %v1358_v9 = vadd.f32 %v1357_v32, %v1356_v8  ;;  %v1359_v10 = vpop.f32.mrb[34].mxu1  ;;  %895 = vadd.xlane.f32.xlu1 %v2142_v47 }
 0x27e   : > { %v1360_v11 = vpop.f32.mrb[35].mxu1 }
 0x27f   : > { %v833_v12 = vadd.f32 %v1358_v9, %v2063_v3  ;;  %v1361_v13 = vadd.f32 %v1360_v11, %v1359_v10 }
 0x281   : > { %v836_v14 = vadd.f32 %v1361_v13, %v2063_v3  ;;  %v2148_v49 = vadd.f32 %v833_v12, %v1989_v52 }
 0x283   : > { %v1362_v15 = vpop.f32.mrb[36].mxu1  ;;  %897 = vadd.xlane.f32.xlu0 %v2148_v49  ;;  %v2152_v50 = vadd.f32 %v836_v14, %v1992_v53 }
 0x284   : > { %v1363_v16 = vpop.f32.mrb[37].mxu1 }
 0x285   : > { %v1364_v17 = vadd.f32 %v1363_v16, %v1362_v15  ;;  %v1365_v18 = vpop.f32.mrb[38].mxu1  ;;  %899 = vadd.xlane.f32.xlu1 %v2152_v50 }
 0x286   : > { %v1366_v19 = vpop.f32.mrb[39].mxu1 }
 0x287   : > { %v841_v20 = vadd.f32 %v1364_v17, %v2063_v3 }
 0x289   : > { %v2157_v22 = vadd.f32 %v841_v20, %v1998_v55 }
 0x28b   : > { %901 = vadd.xlane.f32.xlu0 %v2157_v22 }
 0x2d0   : > { %v866_v52 = vpop.xlane.xlu0 %865 }
 0x2d1   : > { %v904_v4 = vmul.f32 0.0078125, %v866_v52 }
 0x2d3   : > { %v2161_v24 = vsub.f32 %v2068_v33, %v904_v4 }
 0x2d4   : > { %v868_v53 = vpop.xlane.xlu0 %867 }
 0x2d5   : > { %v905_v26 = vmul.f32 0.0078125, %v868_v53  ;;  %v942_v27 = vmul.f32 %v2161_v24, %v2161_v24 }
 0x2d7   : > { %v2166_v28 = vsub.f32 %v2072_v0, %v905_v26  ;;  %961 = vadd.xlane.f32.xlu1 %v942_v27 }
 0x2d8   : > { %v870_v3 = vpop.xlane.xlu1 %869 }
 0x2d9   : > { %v906_v29 = vmul.f32 0.0078125, %v870_v3  ;;  %v943_v55 = vmul.f32 %v2166_v28, %v2166_v28 }
 0x2db   : > { %v2171_v30 = vsub.f32 %v2078_v23, %v906_v29  ;;  %963 = vadd.xlane.f32.xlu0 %v943_v55 }
 0x2dc   : > { %v872_v33 = vpop.xlane.xlu1 %871 }
 0x2dd   : > { %v907_v36 = vmul.f32 0.0078125, %v872_v33  ;;  %v944_v39 = vmul.f32 %v2171_v30, %v2171_v30 }
 0x2df   : > { %v2176_v42 = vsub.f32 %v2082_v25, %v907_v36  ;;  %965 = vadd.xlane.f32.xlu1 %v944_v39 }
 0x2e0   : > { %v874_v0 = vpop.xlane.xlu0 %873 }
 0x2e1   : > { %v908_v45 = vmul.f32 0.0078125, %v874_v0  ;;  %v945_v48 = vmul.f32 %v2176_v42, %v2176_v42 }
 0x2e2   : > { %v876_v51 = vpop.xlane.xlu1 %875 }
 0x2e3   : > { %v2181_v54 = vsub.f32 %v2088_v31, %v908_v45  ;;  %v909_v23 = vmul.f32 0.0078125, %v876_v51  ;;  %967 = vadd.xlane.f32.xlu0 %v945_v48 }
 0x2e5   : > { %v2184_v56 = vsub.f32 %v2092_v7, %v909_v23  ;;  %v946_v57 = vmul.f32 %v2181_v54, %v2181_v54 }
 0x2e7   : > { %969 = vadd.xlane.f32.xlu1 %v946_v57  ;;  %v947_v25 = vmul.f32 %v2184_v56, %v2184_v56 }
 0x2e8   : > { %v878_v58 = vpop.xlane.xlu0 %877 }
 0x2e9   : > { %v910_v59 = vmul.f32 0.0078125, %v878_v58  ;;  %971 = vadd.xlane.f32.xlu0 %v947_v25 }
 0x2ea   : > { %v880_v60 = vpop.xlane.xlu1 %879 }
 0x2eb   : > { %v2191_v61 = vsub.f32 %v2098_v34, %v910_v59  ;;  %v911_v31 = vmul.f32 0.0078125, %v880_v60 }
 0x2ed   : > { %v2194_v62 = vsub.f32 %v2102_v35, %v911_v31  ;;  %v948_v7 = vmul.f32 %v2191_v61, %v2191_v61 }
 0x2ef   : > { %973 = vadd.xlane.f32.xlu1 %v948_v7  ;;  %v949_v1 = vmul.f32 %v2194_v62, %v2194_v62 }
 0x2f0   : > { %v882_v5 = vpop.xlane.xlu0 %881 }
 0x2f1   : > { %v912_v6 = vmul.f32 0.0078125, %v882_v5  ;;  %975 = vadd.xlane.f32.xlu0 %v949_v1 }
 0x2f2   : > { %v884_v8 = vpop.xlane.xlu1 %883 }
 0x2f3   : > { %v2201_v32 = vsub.f32 %v2108_v37, %v912_v6  ;;  %v913_v34 = vmul.f32 0.0078125, %v884_v8  ;;  %v1100_v6 = vsub.s32 2, %v2002_v63 }
 0x2f5   : > { %v2204_v9 = vsub.f32 %v2112_v38, %v913_v34  ;;  %v950_v35 = vmul.f32 %v2201_v32, %v2201_v32  ;;  %v2259_v34 = vrot.slane %v2058_v21, %v328_v2 }
 0x2f7   : > { %977 = vadd.xlane.f32.xlu1 %v950_v35  ;;  %v951_v10 = vmul.f32 %v2204_v9, %v2204_v9 }
 0x2f8   : > { %v886_v11 = vpop.xlane.xlu0 %885 }
 0x2f9   : > { %v914_v12 = vmul.f32 0.0078125, %v886_v11  ;;  %979 = vadd.xlane.f32.xlu0 %v951_v10  ;;  %v2262_v11 = vrot.slane %v2058_v21, %v1100_v6 }
 0x2fa   : > { %v888_v13 = vpop.xlane.xlu1 %887 }
 0x2fb   : > { %v2211_v14 = vsub.f32 %v2118_v40, %v914_v12  ;;  %v915_v37 = vmul.f32 0.0078125, %v888_v13 }
 0x2fd   : > { %v2214_v15 = vsub.f32 %v2122_v41, %v915_v37  ;;  %v952_v38 = vmul.f32 %v2211_v14, %v2211_v14 }
 0x2ff   : > { %981 = vadd.xlane.f32.xlu1 %v952_v38  ;;  %v953_v16 = vmul.f32 %v2214_v15, %v2214_v15 }
 0x300   : > { %v890_v17 = vpop.xlane.xlu0 %889 }
 0x301   : > { %v916_v18 = vmul.f32 0.0078125, %v890_v17  ;;  %983 = vadd.xlane.f32.xlu0 %v953_v16 }
 0x302   : > { %v892_v19 = vpop.xlane.xlu1 %891 }
 0x303   : > { %v2221_v20 = vsub.f32 %v2128_v43, %v916_v18  ;;  %v917_v40 = vmul.f32 0.0078125, %v892_v19 }
 0x305   : > { %v2224_v52 = vsub.f32 %v2132_v44, %v917_v40  ;;  %v954_v41 = vmul.f32 %v2221_v20, %v2221_v20 }
 0x307   : > { %985 = vadd.xlane.f32.xlu1 %v954_v41  ;;  %v955_v4 = vmul.f32 %v2224_v52, %v2224_v52 }
 0x308   : > { %v894_v53 = vpop.xlane.xlu0 %893 }
 0x309   : > { %v918_v26 = vmul.f32 0.0078125, %v894_v53  ;;  %987 = vadd.xlane.f32.xlu0 %v955_v4 }
 0x30a   : > { %v896_v27 = vpop.xlane.xlu1 %895 }
 0x30b   : > { %v2231_v3 = vsub.f32 %v2138_v46, %v918_v26  ;;  %v919_v43 = vmul.f32 0.0078125, %v896_v27 }
 0x30d   : > { %v2234_v29 = vsub.f32 %v2142_v47, %v919_v43  ;;  %v956_v44 = vmul.f32 %v2231_v3, %v2231_v3 }
 0x30f   : > { %989 = vadd.xlane.f32.xlu1 %v956_v44  ;;  %v957_v55 = vmul.f32 %v2234_v29, %v2234_v29 }
 0x310   : > { %v898_v33 = vpop.xlane.xlu0 %897 }
 0x311   : > { %v920_v36 = vmul.f32 0.0078125, %v898_v33  ;;  %991 = vadd.xlane.f32.xlu0 %v957_v55 }
 0x312   : > { %v900_v39 = vpop.xlane.xlu1 %899 }
 0x313   : > { %v2241_v0 = vsub.f32 %v2148_v49, %v920_v36  ;;  %v921_v46 = vmul.f32 0.0078125, %v900_v39 }
 0x315   : > { %v2244_v45 = vsub.f32 %v2152_v50, %v921_v46  ;;  %v958_v47 = vmul.f32 %v2241_v0, %v2241_v0 }
 0x317   : > { %993 = vadd.xlane.f32.xlu1 %v958_v47  ;;  %v959_v48 = vmul.f32 %v2244_v45, %v2244_v45 }
 0x318   : > { %v902_v51 = vpop.xlane.xlu0 %901 }
 0x319   : > { %v922_v23 = vmul.f32 0.0078125, %v902_v51  ;;  %995 = vadd.xlane.f32.xlu0 %v959_v48 }
 0x31b   : > { %v2251_v57 = vsub.f32 %v2157_v22, %v922_v23 }
 0x31d   : > { %v960_v49 = vmul.f32 %v2251_v57, %v2251_v57 }
 0x31f   : > { %997 = vadd.xlane.f32.xlu1 %v960_v49 }
 0x364   : > { %v962_v25 = vpop.xlane.xlu1 %961 }
 0x365   : > { %v999_v50 = vmul.f32 0.0078125, %v962_v25 }
 0x367   : > { %v1018_v58 = vadd.f32 1e-05, %v999_v50 }
 0x368   : > { %v964_v59 = vpop.xlane.xlu0 %963 }
 0x369   : > { %1484 = vrsqrt.f32 %v1018_v58  ;;  %v1000_v60 = vmul.f32 0.0078125, %v964_v59 }
 0x36b   : > { %v1019_v31 = vadd.f32 1e-05, %v1000_v60 }
 0x36c   : > { %v966_v7 = vpop.xlane.xlu1 %965 }
 0x36d   : > { %1486 = vrsqrt.f32 %v1019_v31  ;;  %v1001_v1 = vmul.f32 0.0078125, %v966_v7 }
 0x36f   : > { %v1020_v5 = vadd.f32 1e-05, %v1001_v1 }
 0x370   : > { %v968_v8 = vpop.xlane.xlu0 %967 }
 0x371   : > { %1488 = vrsqrt.f32 %v1020_v5  ;;  %v1002_v22 = vmul.f32 0.0078125, %v968_v8 }
 0x373   : > { %v1485_v35 = vpop.eup %1484  ;;  %v1021_v10 = vadd.f32 1e-05, %v1002_v22 }
 0x374   : > { %v1056_v12 = vmul.f32 %v1485_v35, %v2161_v24  ;;  %v970_v13 = vpop.xlane.xlu1 %969 }
 0x375   : > { %1490 = vrsqrt.f32 %v1021_v10  ;;  %v1003_v37 = vmul.f32 0.0078125, %v970_v13 }
 0x376   : > { %v1079_v38 = vmul.f32 %v2259_v34, %v1056_v12  ;;  %v972_v16 = vpop.xlane.xlu0 %971 }
 0x377   : > { %v1487_v17 = vpop.eup %1486  ;;  %v1022_v18 = vadd.f32 1e-05, %v1003_v37  ;;  %v1004_v63 = vmul.f32 0.0078125, %v972_v16 }
 0x378   : > { %v1102_v2 = vadd.f32 %v2262_v11, %v1079_v38  ;;  %v1057_v19 = vmul.f32 %v1487_v17, %v2166_v28 }
 0x379   : > { %1492 = vrsqrt.f32 %v1022_v18  ;;  %v1023_v40 = vadd.f32 1e-05, %v1004_v63 }
 0x37a   : > { %1121 = vst [vmem:[%s2270_s14] sm:$0xff] %v1102_v2  ;;  %v1080_v21 = vmul.f32 %v2259_v34, %v1057_v19 }
 0x37b   : > { %v1489_v24 = vpop.eup %1488  ;;  %1494 = vrsqrt.f32 %v1023_v40 }
 0x37c   : > { %v1103_v41 = vadd.f32 %v2262_v11, %v1080_v21  ;;  %v1058_v4 = vmul.f32 %v1489_v24, %v2171_v30  ;;  %v974_v53 = vpop.xlane.xlu1 %973 }
 0x37d   : > { %v1005_v26 = vmul.f32 0.0078125, %v974_v53 }
 0x37e   : > { %1122 = vst [vmem:[%s2270_s14 + $0x8] sm:$0xff] %v1103_v41  ;;  %v1081_v28 = vmul.f32 %v2259_v34, %v1058_v4  ;;  %v976_v27 = vpop.xlane.xlu0 %975 }
 0x37f   : > { %v1491_v43 = vpop.eup %1490  ;;  %v1024_v44 = vadd.f32 1e-05, %v1005_v26  ;;  %v1006_v55 = vmul.f32 0.0078125, %v976_v27 }
 0x380   : > { %v1104_v33 = vadd.f32 %v2262_v11, %v1081_v28  ;;  %v1059_v36 = vmul.f32 %v1491_v43, %v2176_v42 }
 0x381   : > { %1496 = vrsqrt.f32 %v1024_v44  ;;  %v1025_v39 = vadd.f32 1e-05, %v1006_v55 }
 0x382   : > { %1123 = vst [vmem:[%s2270_s14 + $0x10] sm:$0xff] %v1104_v33  ;;  %v1082_v46 = vmul.f32 %v2259_v34, %v1059_v36 }
 0x383   : > { %v1493_v30 = vpop.eup %1492  ;;  %1498 = vrsqrt.f32 %v1025_v39 }
 0x384   : > { %v1105_v47 = vadd.f32 %v2262_v11, %v1082_v46  ;;  %v1060_v48 = vmul.f32 %v1493_v30, %v2181_v54  ;;  %v978_v51 = vpop.xlane.xlu1 %977 }
 0x385   : > { %v1495_v23 = vpop.eup %1494  ;;  %v1007_v49 = vmul.f32 0.0078125, %v978_v51 }
 0x386   : > { %1124 = vst [vmem:[%s2270_s14 + $0x18] sm:$0xff] %v1105_v47  ;;  %v1083_v25 = vmul.f32 %v2259_v34, %v1060_v48  ;;  %v1061_v42 = vmul.f32 %v1495_v23, %v2184_v56  ;;  %v980_v50 = vpop.xlane.xlu0 %979 }
 0x387   : > { %v1026_v58 = vadd.f32 1e-05, %v1007_v49  ;;  %v1008_v59 = vmul.f32 0.0078125, %v980_v50 }
 0x388   : > { %v1106_v60 = vadd.f32 %v2262_v11, %v1083_v25  ;;  %v1084_v31 = vmul.f32 %v2259_v34, %v1061_v42 }
 0x389   : > { %1500 = vrsqrt.f32 %v1026_v58  ;;  %v1027_v7 = vadd.f32 1e-05, %v1008_v59 }
 0x38a   : > { %1125 = vst [vmem:[%s2270_s14 + $0x20] sm:$0xff] %v1106_v60  ;;  %v1107_v54 = vadd.f32 %v2262_v11, %v1084_v31 }
 0x38b   : > { %v1497_v1 = vpop.eup %1496  ;;  %1502 = vrsqrt.f32 %v1027_v7 }
 0x38c   : > { %1126 = vst [vmem:[%s2270_s14 + $0x28] sm:$0xff] %v1107_v54  ;;  %v1062_v5 = vmul.f32 %v1497_v1, %v2191_v61  ;;  %v982_v6 = vpop.xlane.xlu1 %981 }
 0x38d   : > { %v1499_v56 = vpop.eup %1498  ;;  %v1009_v8 = vmul.f32 0.0078125, %v982_v6 }
 0x38e   : > { %v1085_v22 = vmul.f32 %v2259_v34, %v1062_v5  ;;  %v1063_v35 = vmul.f32 %v1499_v56, %v2194_v62  ;;  %v984_v10 = vpop.xlane.xlu0 %983 }
 0x38f   : > { %v1028_v12 = vadd.f32 1e-05, %v1009_v8  ;;  %v1010_v13 = vmul.f32 0.0078125, %v984_v10 }
 0x390   : > { %v1108_v37 = vadd.f32 %v2262_v11, %v1085_v22  ;;  %v1086_v38 = vmul.f32 %v2259_v34, %v1063_v35 }
 0x391   : > { %1504 = vrsqrt.f32 %v1028_v12  ;;  %v1029_v16 = vadd.f32 1e-05, %v1010_v13 }
 0x392   : > { %1127 = vst [vmem:[%s2270_s14 + $0x30] sm:$0xff] %v1108_v37  ;;  %v1109_v61 = vadd.f32 %v2262_v11, %v1086_v38 }
 0x393   : > { %v1501_v17 = vpop.eup %1500  ;;  %1506 = vrsqrt.f32 %v1029_v16 }
 0x394   : > { %1128 = vst [vmem:[%s2270_s14 + $0x38] sm:$0xff] %v1109_v61  ;;  %v1064_v18 = vmul.f32 %v1501_v17, %v2201_v32  ;;  %v986_v63 = vpop.xlane.xlu1 %985 }
 0x395   : > { %v1503_v62 = vpop.eup %1502  ;;  %v1011_v2 = vmul.f32 0.0078125, %v986_v63 }
 0x396   : > { %v1087_v19 = vmul.f32 %v2259_v34, %v1064_v18  ;;  %v1065_v40 = vmul.f32 %v1503_v62, %v2204_v9  ;;  %v988_v21 = vpop.xlane.xlu0 %987 }
 0x397   : > { %v1030_v24 = vadd.f32 1e-05, %v1011_v2  ;;  %v1012_v41 = vmul.f32 0.0078125, %v988_v21 }
 0x398   : > { %v1110_v4 = vadd.f32 %v2262_v11, %v1087_v19  ;;  %v1088_v53 = vmul.f32 %v2259_v34, %v1065_v40 }
 0x399   : > { %1508 = vrsqrt.f32 %v1030_v24  ;;  %v1031_v26 = vadd.f32 1e-05, %v1012_v41 }
 0x39a   : > { %1129 = vst [vmem:[%s2270_s14 + $0x40] sm:$0xff] %v1110_v4  ;;  %v1111_v32 = vadd.f32 %v2262_v11, %v1088_v53 }
 0x39b   : > { %v1505_v28 = vpop.eup %1504  ;;  %1510 = vrsqrt.f32 %v1031_v26 }
 0x39c   : > { %1130 = vst [vmem:[%s2270_s14 + $0x48] sm:$0xff] %v1111_v32  ;;  %v1066_v27 = vmul.f32 %v1505_v28, %v2211_v14  ;;  %v990_v43 = vpop.xlane.xlu1 %989 }
 0x39d   : > { %v1507_v9 = vpop.eup %1506  ;;  %v1013_v44 = vmul.f32 0.0078125, %v990_v43 }
 0x39e   : > { %v1089_v55 = vmul.f32 %v2259_v34, %v1066_v27  ;;  %v1067_v33 = vmul.f32 %v1507_v9, %v2214_v15  ;;  %v992_v36 = vpop.xlane.xlu0 %991 }
 0x39f   : > { %v1032_v39 = vadd.f32 1e-05, %v1013_v44  ;;  %v1014_v46 = vmul.f32 0.0078125, %v992_v36 }
 0x3a0   : > { %v1112_v30 = vadd.f32 %v2262_v11, %v1089_v55  ;;  %v1090_v47 = vmul.f32 %v2259_v34, %v1067_v33 }
 0x3a1   : > { %1512 = vrsqrt.f32 %v1032_v39  ;;  %v1033_v48 = vadd.f32 1e-05, %v1014_v46 }
 0x3a2   : > { %1131 = vst [vmem:[%s2270_s14 + $0x50] sm:$0xff] %v1112_v30  ;;  %v1113_v14 = vadd.f32 %v2262_v11, %v1090_v47 }
 0x3a3   : > { %v1509_v51 = vpop.eup %1508  ;;  %1514 = vrsqrt.f32 %v1033_v48 }
 0x3a4   : > { %1132 = vst [vmem:[%s2270_s14 + $0x58] sm:$0xff] %v1113_v14  ;;  %v1068_v23 = vmul.f32 %v1509_v51, %v2221_v20  ;;  %v994_v49 = vpop.xlane.xlu1 %993 }
 0x3a5   : > { %v1511_v15 = vpop.eup %1510  ;;  %v1015_v25 = vmul.f32 0.0078125, %v994_v49 }
 0x3a6   : > { %v1091_v42 = vmul.f32 %v2259_v34, %v1068_v23  ;;  %v1069_v50 = vmul.f32 %v1511_v15, %v2224_v52  ;;  %v996_v58 = vpop.xlane.xlu0 %995 }
 0x3a7   : > { %v1034_v59 = vadd.f32 1e-05, %v1015_v25  ;;  %v1016_v60 = vmul.f32 0.0078125, %v996_v58 }
 0x3a8   : > { %v1114_v31 = vadd.f32 %v2262_v11, %v1091_v42  ;;  %v1092_v7 = vmul.f32 %v2259_v34, %v1069_v50 }
 0x3a9   : > { %1516 = vrsqrt.f32 %v1034_v59  ;;  %v1035_v54 = vadd.f32 1e-05, %v1016_v60 }
 0x3aa   : > { %1133 = vst [vmem:[%s2270_s14 + $0x60] sm:$0xff] %v1114_v31  ;;  %v1115_v20 = vadd.f32 %v2262_v11, %v1092_v7 }
 0x3ab   : > { %v1513_v1 = vpop.eup %1512  ;;  %1518 = vrsqrt.f32 %v1035_v54 }
 0x3ac   : > { %1134 = vst [vmem:[%s2270_s14 + $0x68] sm:$0xff] %v1115_v20  ;;  %v1070_v5 = vmul.f32 %v1513_v1, %v2231_v3  ;;  %v998_v52 = vpop.xlane.xlu1 %997 }
 0x3ad   : > { %v1515_v6 = vpop.eup %1514  ;;  %v1017_v56 = vmul.f32 0.0078125, %v998_v52 }
 0x3ae   : > { %v1093_v8 = vmul.f32 %v2259_v34, %v1070_v5  ;;  %v1071_v22 = vmul.f32 %v1515_v6, %v2234_v29 }
 0x3af   : > { %v1036_v35 = vadd.f32 1e-05, %v1017_v56 }
 0x3b0   : > { %v1116_v10 = vadd.f32 %v2262_v11, %v1093_v8  ;;  %v1094_v12 = vmul.f32 %v2259_v34, %v1071_v22 }
 0x3b1   : > { %1520 = vrsqrt.f32 %v1036_v35 }
 0x3b2   : > { %1135 = vst [vmem:[%s2270_s14 + $0x70] sm:$0xff] %v1116_v10  ;;  %v1117_v3 = vadd.f32 %v2262_v11, %v1094_v12 }
 0x3b3   : > { %v1517_v13 = vpop.eup %1516 }
 0x3b4   : > { %1136 = vst [vmem:[%s2270_s14 + $0x78] sm:$0xff] %v1117_v3  ;;  %v1072_v37 = vmul.f32 %v1517_v13, %v2241_v0 }
 0x3b5   : > { %v1519_v38 = vpop.eup %1518 }
 0x3b6   : > { %v1095_v29 = vmul.f32 %v2259_v34, %v1072_v37  ;;  %v1073_v16 = vmul.f32 %v1519_v38, %v2244_v45 }
 0x3b8   : > { %v1118_v61 = vadd.f32 %v2262_v11, %v1095_v29  ;;  %v1096_v17 = vmul.f32 %v2259_v34, %v1073_v16 }
 0x3ba   : > { %1137 = vst [vmem:[%s2270_s14 + $0x80] sm:$0xff] %v1118_v61  ;;  %v1119_v18 = vadd.f32 %v2262_v11, %v1096_v17 }
 0x3bb   : > { %v1521_v63 = vpop.eup %1520 }
 0x3bc   : > { %1138 = vst [vmem:[%s2270_s14 + $0x88] sm:$0xff] %v1119_v18  ;;  %v1074_v0 = vmul.f32 %v1521_v63, %v2251_v57 }
 0x3be   : > { %v1097_v62 = vmul.f32 %v2259_v34, %v1074_v0 }
 0x3c0   : > { %v1120_v45 = vadd.f32 %v2262_v11, %v1097_v62 }
 0x3c2   : > { %1139 = vst [vmem:[%s2270_s14 + $0x90] sm:$0xff] %v1120_v45 }
 0x3c3   : > { %1621 = shalt.err (!%p1618_p1)
}
 0x3c4   : > { %s1622_s10 = scalar_lea.hbm %s2347_s13, 2432  ;;  %s1626_s16 = scalar_lea.hbm %s2400_s5, 4864 }
 0x3c5   : > { %p1623_p13 = scmp.ne.s32.totalorder %s2347_s13, %s1622_s10  ;;  %p1627_p4 = scmp.lt.u32.totalorder %s2347_s13, %s2400_s5 }
 0x3c6   : > { %p1628_p7 = scmp.lt.u32.totalorder %s1626_s16, %s1622_s10  ;;  %p1630_p11 = scmp.lt.u32.totalorder %s1622_s10, %s2347_s13 }
 0x3c7   : > { %p1624_p6 = pnand %p1623_p13, %p2416_p0 }
 0x3c8   : > { %p1629_p8 = por %p1628_p7, %p1627_p4 }
 0x3c9   : > { %p1625_p10 = pneg %p1624_p6 }
 0x3ca   : > { %p1631_p2 = por %p1630_p11, %p1629_p8 }
 0x3cc   : > { %p1632_p3 = pnand %p1631_p2, %p1625_p10 }
 0x3ce   : > { %1635 = shalt.err (!%p1632_p3)
}
 0x3cf   : > { %s1689_s17 = smov 128   ;;  %s1690_s29 = smov 8  }
 0x3d0   : > { %1380 = dma.vmem_to_hbm [thread:$0]  (%p2416_p0), %s2349_s28, 2432, %s2347_s13, %s1141_s22, %s1689_s17, %s1689_s17, %s1690_s29  }
 0x3d1 PF: > { %s1169_s9 = sand.u32 1, %s1666_s18   ;;  %p2417_p5 = scmp.ne.s32.totalorder %s2406_s25, 0 }
 0x3d2   : > { %p2418_p9 = scmp.ge.s32.totalorder %s1678_s21, 2  ;;  %s1170_s15 = scalar_lea.sflag [#allocation4], %s1169_s9 }
 0x3d4   : > { %p1394_p12 = pnand %p2418_p9, %p2417_p5 }
 0x3d6   : > { %1661 = dma.done.wait (!%p1394_p12), %s1170_s15, 2432  }
 0x3d7   : > { %1663 = vsyncadd (!%p1394_p12), %s1170_s15, 4294964864  ;;  %p19_p1 = scmp.ge.s32.totalorder %s1834_s23, 4   ;;  %s2419_s18 = smov %s1670_s19 }
 0x3d8   : > { %s2420_s19 = smov %s1674_s20  ;;  %s2421_s20 = smov %s1843_s7 }
 0x3d9   : > { %s2422_s21 = smov %s1834_s23  ;;  %21 = sbr.rel (!%p19_p1) target bundleno = 6 (0x6), region = 93 }
 0x3e0   :  { %1175 = vsyncpa [#allocation3], 1 }
 0x3e1   :  { %1177 = vsyncpa [#allocation3 + $0x1], 1 }
 0x3e2   :  { %1178 = vsyncpa [#allocation6], 1 }
 0x3e3   :  { %1179 = vsyncpa [#allocation4], 1 }
 0x3e4   :  { %1181 = vsyncpa [#allocation4 + $0x1], 1 }

</bundles_post_ra>
